<compile_context>
chip_gen: v7x
topology: tpu7x:2x2x1
jax: 0.10.0
libtpu: 0.0.40
codegen_flags: <defaults>
</compile_context>

<pallas_src>
import functools

import jax
import jax.numpy as jnp
from jax import lax
from jax.experimental import pallas as pl
from jax.experimental.pallas import tpu as pltpu


# -----------------------------------------------------------------------------
# Fused kernel: n_layers LSTM recurrence + dropout(0.5) + Linear(H -> 1)
# -----------------------------------------------------------------------------
def _fused_lstm_head_kernel(*refs, n_layers, tile_t, hidden_dim, unroll):
    # inputs : x (tT,Bb,D), keep_mask (tT,Bb,H) bf16,
    #          wih0 (D,4H), whh0 (H,4H), b0 (1,4H),
    #          [wcat_l (2H,4H), b_l (1,4H)] for l=1..L-1,
    #          h0 (L,Bb,H), c0 (L,Bb,H), fc_w*2 (1,H), fc_b (1,1)
    # outputs: out (Bb,tT)                      <- lane-dense (time on lanes)
    # scratch: h_scr (L,Bb,H), c_scr (L,Bb,H), gx_scr (tT,Bb,4H)
    L = n_layers
    n_in = 2 + 3 + 2 * (L - 1) + 4
    in_refs = refs[:n_in]
    out_ref = refs[n_in]
    h_scr, c_scr, gx_scr = refs[n_in + 1:]

    x_ref, mask_ref = in_refs[0], in_refs[1]
    wih0_ref, whh0_ref, b0_ref = in_refs[2], in_refs[3], in_refs[4]
    layer_refs = in_refs[5:5 + 2 * (L - 1)]
    h0_ref, c0_ref, fcw_ref, fcb_ref = in_refs[5 + 2 * (L - 1):]

    H = hidden_dim
    T = tile_t
    Bb = x_ref.shape[1]
    D = x_ref.shape[2]

    # Persistent hidden/cell state: (re)initialize at the first time tile of each batch chunk.
    @pl.when(pl.program_id(1) == 0)
    def _():
        h_scr[...] = h0_ref[...]
        c_scr[...] = c0_ref[...]

    # Layer-0 input projection for the whole tile as one MXU matmul (bias folded in).
    # This keeps the x projection off the serial recurrence chain.
    x_flat = x_ref[...].reshape(T * Bb, D)
    gx = jnp.dot(x_flat, wih0_ref[...], preferred_element_type=jnp.float32) + b0_ref[...]
    gx_scr[...] = gx.reshape(T, Bb, 4 * H)

    # --- hoist all weight / bias / head loads out of the unrolled step body (item 3) ---
    whh0 = whh0_ref[...]                                            # (H, 4H)
    wcat = [layer_refs[2 * i][...] for i in range(L - 1)]           # (2H, 4H)
    bcat = [layer_refs[2 * i + 1][...] for i in range(L - 1)]       # (1, 4H)
    w_head = fcw_ref[...]                                           # (1, H) = 2*fc_w
    lane_ids = lax.broadcasted_iota(jnp.int32, (Bb, T), 1)          # column selector (hoisted)

    h_init = tuple(h_scr[l] for l in range(L))
    c_init = tuple(c_scr[l] for l in range(L))
    acc_init = jnp.zeros((Bb, T), jnp.float32)

    def cell(gates, c_prev):
        # gate columns pre-permuted to (i, f, o | g): ONE sigmoid + ONE tanh per layer-step
        ifo = jax.nn.sigmoid(gates[:, :3 * H])
        g_g = jnp.tanh(gates[:, 3 * H:])
        i_g = ifo[:, 0:H]
        f_g = ifo[:, H:2 * H]
        o_g = ifo[:, 2 * H:3 * H]
        c_n = f_g * c_prev + i_g * g_g
        h_n = o_g * jnp.tanh(c_n)
        return h_n, c_n

    def step(t, carry):
        hs, cs, acc = carry
        new_h, new_c = [], []

        # layer 0: x-part precomputed, single recurrent matmul on the chain
        gates0 = gx_scr[t] + jnp.dot(hs[0], whh0, preferred_element_type=jnp.float32)
        h_n, c_n = cell(gates0, cs[0])
        new_h.append(h_n)
        new_c.append(c_n)

        # layers l>0: merged K-concat matmul (one MXU push instead of two)
        for l in range(1, L):
            inp = jnp.concatenate([new_h[l - 1], hs[l]], axis=-1)            # (Bb, 2H)
            gates = jnp.dot(inp, wcat[l - 1],
                            preferred_element_type=jnp.float32) + bcat[l - 1]
            h_n, c_n = cell(gates, cs[l])
            new_h.append(h_n)
            new_c.append(c_n)

        # fused head: dropout keep-mask * (2*fc_w), reduce over H -> one column of the output.
        # Feeds nothing in the next step, so it overlaps with the next recurrence step.
        m = mask_ref[t].astype(jnp.float32)                                   # (Bb, H)
        head = jnp.sum(new_h[-1] * m * w_head, axis=-1, keepdims=True)        # (Bb, 1)
        acc = jnp.where(lane_ids == t, head, acc)
        return tuple(new_h), tuple(new_c), acc

    hs, cs, acc = lax.fori_loop(0, T, step, (h_init, c_init, acc_init), unroll=unroll)

    # Carry recurrent state to the next time tile.
    for l in range(L):
        h_scr[l] = hs[l]
        c_scr[l] = cs[l]

    # Single lane-dense store: (Bb, tile_t) with time on lanes.
    out_ref[...] = acc + fcb_ref[...]


# -----------------------------------------------------------------------------
# Wrapper
# -----------------------------------------------------------------------------
def lstm_net_dropout_forward(x, lstm_params, fc_w, fc_b, h0, c0, keep_mask,
                             *, tile_t=None, batch_chunks=1):
    """x: (B, T, input_dim) batch_first (PyTorch convention).
    lstm_params: [(w_ih.T (D_l,4H), w_hh.T (H,4H), b_ih+b_hh (1,4H)), ...] PyTorch gate order.
    keep_mask: (T, B, H) Bernoulli(0.5) keep mask for the dropout layer.
    Returns (B, T) like `self.fc(out).squeeze()`."""
    B, T, D = x.shape
    L = len(lstm_params)
    H = h0.shape[-1]

    assert B % batch_chunks == 0, (B, batch_chunks)
    Bb = B // batch_chunks
    # batch-chunk blocks must keep sublane alignment (or be the whole batch)
    assert batch_chunks == 1 or Bb % 8 == 0, (B, batch_chunks)

    x_tm = jnp.transpose(x, (1, 0, 2)).astype(jnp.float32)        # (T, B, D) time-major
    mask_bf = keep_mask.astype(jnp.bfloat16)                      # (T, B, H), half the bytes

    if tile_t is None:
        tile_t = T
        for cand in (256, 128, 64, 32, 16, 8):
            if T % cand == 0:
                tile_t = cand
                break
    assert T % tile_t == 0, (T, tile_t)
    unroll = tile_t if tile_t <= 16 else 8                        # bounded unroll for big tiles

    # Gate-column permutation: PyTorch (i,f,g,o) -> (i,f,o,g).
    def perm(w):
        i, f, g, o = jnp.split(w.astype(jnp.float32), 4, axis=-1)
        return jnp.concatenate([i, f, o, g], axis=-1)

    wih0, whh0, b0 = lstm_params[0]
    wih0, whh0, b0 = perm(wih0), perm(whh0), perm(b0)

    merged = []                                                   # layers 1..L-1: (W_cat, b)
    for l in range(1, L):
        wih_l, whh_l, b_l = lstm_params[l]
        wcat = jnp.concatenate([perm(wih_l), perm(whh_l)], axis=0)   # (2H, 4H)
        merged.append((wcat, perm(b_l)))

    fcw2 = (fc_w.reshape(1, H) * 2.0).astype(jnp.float32)         # fold inverted-dropout scale
    fcb = fc_b.reshape(1, 1).astype(jnp.float32)

    kernel = functools.partial(_fused_lstm_head_kernel, n_layers=L,
                               tile_t=tile_t, hidden_dim=H, unroll=unroll)

    def full(shape):
        # whole-array block, constant block index -> resident across the grid
        return pl.BlockSpec(shape, lambda bc, t, _n=len(shape): (0,) * _n)

    in_specs = [
        pl.BlockSpec((tile_t, Bb, D), lambda bc, t: (t, bc, 0)),  # x tile
        pl.BlockSpec((tile_t, Bb, H), lambda bc, t: (t, bc, 0)),  # dropout mask tile (bf16)
        full(wih0.shape), full(whh0.shape), full(b0.shape),
    ]
    args = [x_tm, mask_bf, wih0, whh0, b0]
    for (wcat, b_l) in merged:
        in_specs += [full(wcat.shape), full(b_l.shape)]
        args += [wcat, b_l]
    in_specs += [
        pl.BlockSpec((L, Bb, H), lambda bc, t: (0, bc, 0)),       # h0
        pl.BlockSpec((L, Bb, H), lambda bc, t: (0, bc, 0)),       # c0
        full(fcw2.shape), full(fcb.shape),
    ]
    args += [h0.astype(jnp.float32), c0.astype(jnp.float32), fcw2, fcb]

    out = pl.pallas_call(
        kernel,
        out_shape=jax.ShapeDtypeStruct((B, T), jnp.float32),
        grid=(batch_chunks, T // tile_t),
        in_specs=in_specs,
        out_specs=pl.BlockSpec((Bb, tile_t), lambda bc, t: (bc, t)),   # lane-dense (time on lanes)
        scratch_shapes=[
            pltpu.VMEM((L, Bb, H), jnp.float32),                  # persistent h
            pltpu.VMEM((L, Bb, H), jnp.float32),                  # persistent c
            pltpu.VMEM((tile_t, Bb, 4 * H), jnp.float32),         # precomputed x-gates
        ],
        compiler_params=pltpu.CompilerParams(
            dimension_semantics=("parallel", "arbitrary")),       # batch chunks || , time serial
    )(*args)
    return out                                                    # (B, T), PyTorch squeeze()


# -----------------------------------------------------------------------------
# Pure-JAX reference (PyTorch gate order, un-permuted / un-merged weights)
# -----------------------------------------------------------------------------
def _reference_forward(x, lstm_params, fc_w, fc_b, h0, c0, keep_mask):
    B, T, _ = x.shape
    inp = jnp.transpose(x, (1, 0, 2)).astype(jnp.float32)
    for l, (wih_t, whh_t, b) in enumerate(lstm_params):
        H = whh_t.shape[0]
        h, c = h0[l], c0[l]
        outs = []
        for t in range(T):
            gates = inp[t] @ wih_t + h @ whh_t + b
            i = jax.nn.sigmoid(gates[:, 0 * H:1 * H])
            f = jax.nn.sigmoid(gates[:, 1 * H:2 * H])
            g = jnp.tanh(gates[:, 2 * H:3 * H])
            o = jax.nn.sigmoid(gates[:, 3 * H:4 * H])
            c = f * c + i * g
            h = o * jnp.tanh(c)
            outs.append(h)
        inp = jnp.stack(outs, axis=0)
    dropped = inp * keep_mask.astype(jnp.float32) * 2.0
    out = jnp.einsum('tbh,h->tb', dropped, fc_w.reshape(-1)) + fc_b.reshape(())
    return jnp.transpose(out, (1, 0))


# -----------------------------------------------------------------------------
# Deterministic parameter construction (PyTorch nn.LSTM shapes / gate order)
# -----------------------------------------------------------------------------
def make_params(key, input_dim, hidden_dim, n_layers, batch_size):
    keys = jax.random.split(key, 4 * n_layers + 4)
    k = 1.0 / jnp.sqrt(hidden_dim)
    lstm_params = []
    ki = 0
    for layer in range(n_layers):
        d_in = input_dim if layer == 0 else hidden_dim
        w_ih = jax.random.uniform(keys[ki + 0], (4 * hidden_dim, d_in),
                                  minval=-k, maxval=k, dtype=jnp.float32)
        w_hh = jax.random.uniform(keys[ki + 1], (4 * hidden_dim, hidden_dim),
                                  minval=-k, maxval=k, dtype=jnp.float32)
        b_ih = jax.random.uniform(keys[ki + 2], (4 * hidden_dim,),
                                  minval=-k, maxval=k, dtype=jnp.float32)
        b_hh = jax.random.uniform(keys[ki + 3], (4 * hidden_dim,),
                                  minval=-k, maxval=k, dtype=jnp.float32)
        ki += 4
        lstm_params.append((w_ih.T, w_hh.T, (b_ih + b_hh)[None, :]))

    fc_w = jax.random.uniform(keys[ki + 0], (1, hidden_dim),
                              minval=-k, maxval=k, dtype=jnp.float32)
    fc_b = jax.random.uniform(keys[ki + 1], (1,),
                              minval=-k, maxval=k, dtype=jnp.float32)
    h0 = jax.random.normal(keys[ki + 2], (n_layers, batch_size, hidden_dim),
                           dtype=jnp.float32)
    c0 = jax.random.normal(keys[ki + 3], (n_layers, batch_size, hidden_dim),
                           dtype=jnp.float32)
    return lstm_params, fc_w, fc_b, h0, c0


if __name__ == "__main__":
    def run_case(input_dim, hidden_dim, n_layers, batch_size, seq_len, tile_t=None):
        key = jax.random.PRNGKey(0)
        k_param, k_x, k_drop = jax.random.split(key, 3)
        lstm_params, fc_w, fc_b, h0, c0 = make_params(
            k_param, input_dim, hidden_dim, n_layers, batch_size)
        x = jax.random.normal(k_x, (batch_size, seq_len, input_dim), dtype=jnp.float32)
        keep_mask = jax.random.bernoulli(
            k_drop, 0.5, (seq_len, batch_size, hidden_dim)).astype(jnp.float32)

        out = lstm_net_dropout_forward(x, lstm_params, fc_w, fc_b, h0, c0, keep_mask,
                                       tile_t=tile_t)
        out = jax.block_until_ready(out)
        assert out.shape == (batch_size, seq_len), out.shape

        ref = _reference_forward(x, lstm_params, fc_w, fc_b, h0, c0, keep_mask)
        err = float(jnp.max(jnp.abs(out - ref)))
        assert jnp.allclose(out, ref, atol=1e-4, rtol=1e-4), err

    # 2-layer (module variant #5), single time tile
    run_case(4, 32, 2, 2, 8)
    # 2-layer, two time tiles -> exercises h/c carry across the time grid
    run_case(4, 32, 2, 2, 16, tile_t=8)
    # 1-layer (module variant #4)
    run_case(4, 32, 1, 2, 8)

    print("KERNEL_OK")
</pallas_src>

<mosaic_0001>
module attributes {stable_mosaic.version = 11 : i64} {
  func.func @_fused_lstm_head_kernel(%arg0: i32, %arg1: i32, %arg2: memref<8x2x4xf32, #tpu.memory_space<vmem>>, %arg3: memref<8x2x32xbf16, #tpu.memory_space<vmem>>, %arg4: memref<4x128xf32, #tpu.memory_space<vmem>>, %arg5: memref<32x128xf32, #tpu.memory_space<vmem>>, %arg6: memref<1x128xf32, #tpu.memory_space<vmem>>, %arg7: memref<64x128xf32, #tpu.memory_space<vmem>>, %arg8: memref<1x128xf32, #tpu.memory_space<vmem>>, %arg9: memref<2x2x32xf32, #tpu.memory_space<vmem>>, %arg10: memref<2x2x32xf32, #tpu.memory_space<vmem>>, %arg11: memref<1x32xf32, #tpu.memory_space<vmem>>, %arg12: memref<1x1xf32, #tpu.memory_space<vmem>>, %arg13: memref<2x8xf32, #tpu.memory_space<vmem>>, %arg14: memref<2x2x32xf32, #tpu.memory_space<vmem>>, %arg15: memref<2x2x32xf32, #tpu.memory_space<vmem>>, %arg16: memref<8x2x128xf32, #tpu.memory_space<vmem>>) attributes {dimension_semantics = [#tpu.dimension_semantics<parallel>, #tpu.dimension_semantics<arbitrary>], iteration_bounds = array<i64: 1, 1>, scalar_prefetch = 0 : i64, scratch_operands = 3 : i64, tpu.core_type = #tpu.core_type<tc>, window_params = [{transform_indices = @transform_0, window_bounds = array<i64: 8, 2, 4>}, {transform_indices = @transform_1, window_bounds = array<i64: 8, 2, 32>}, {pipeline_mode = #tpu.pipeline_mode<synchronous>, transform_indices = @transform_2, window_bounds = array<i64: 4, 128>}, {pipeline_mode = #tpu.pipeline_mode<synchronous>, transform_indices = @transform_3, window_bounds = array<i64: 32, 128>}, {pipeline_mode = #tpu.pipeline_mode<synchronous>, transform_indices = @transform_4, window_bounds = array<i64: 1, 128>}, {pipeline_mode = #tpu.pipeline_mode<synchronous>, transform_indices = @transform_5, window_bounds = array<i64: 64, 128>}, {pipeline_mode = #tpu.pipeline_mode<synchronous>, transform_indices = @transform_6, window_bounds = array<i64: 1, 128>}, {transform_indices = @transform_7, window_bounds = array<i64: 2, 2, 32>}, {transform_indices = @transform_8, window_bounds = array<i64: 2, 2, 32>}, {pipeline_mode = #tpu.pipeline_mode<synchronous>, transform_indices = @transform_9, window_bounds = array<i64: 1, 32>}, {pipeline_mode = #tpu.pipeline_mode<synchronous>, transform_indices = @transform_10, window_bounds = array<i64: 1, 1>}, {transform_indices = @transform_11, window_bounds = array<i64: 2, 8>}]} {
    %c0_i32 = arith.constant 0 : i32
    %0 = arith.cmpi eq, %arg1, %c0_i32 : i32
    %1 = arith.extui %0 : i1 to i32
    %c0_i32_0 = arith.constant 0 : i32
    %2 = arith.cmpi ne, %1, %c0_i32_0 : i32
    scf.if %2 {
      %c0_119 = arith.constant 0 : index
      %c0_120 = arith.constant 0 : index
      %c0_121 = arith.constant 0 : index
      %482 = vector.load %arg9[%c0_119, %c0_120, %c0_121] : memref<2x2x32xf32, #tpu.memory_space<vmem>>, vector<2x2x32xf32>
      %c0_122 = arith.constant 0 : index
      %c0_123 = arith.constant 0 : index
      %c0_124 = arith.constant 0 : index
      %483 = vector.load %arg14[%c0_122, %c0_123, %c0_124] : memref<2x2x32xf32, #tpu.memory_space<vmem>>, vector<2x2x32xf32>
      tpu.vector_store %arg14[%c0_122, %c0_123, %c0_124], %482 {strides = array<i32>} : memref<2x2x32xf32, #tpu.memory_space<vmem>>, vector<2x2x32xf32>,
      %c0_125 = arith.constant 0 : index
      %c0_126 = arith.constant 0 : index
      %c0_127 = arith.constant 0 : index
      %484 = vector.load %arg10[%c0_125, %c0_126, %c0_127] : memref<2x2x32xf32, #tpu.memory_space<vmem>>, vector<2x2x32xf32>
      %c0_128 = arith.constant 0 : index
      %c0_129 = arith.constant 0 : index
      %c0_130 = arith.constant 0 : index
      %485 = vector.load %arg15[%c0_128, %c0_129, %c0_130] : memref<2x2x32xf32, #tpu.memory_space<vmem>>, vector<2x2x32xf32>
      tpu.vector_store %arg15[%c0_128, %c0_129, %c0_130], %484 {strides = array<i32>} : memref<2x2x32xf32, #tpu.memory_space<vmem>>, vector<2x2x32xf32>,
    } else {
    }
    %c0 = arith.constant 0 : index
    %c0_1 = arith.constant 0 : index
    %c0_2 = arith.constant 0 : index
    %3 = vector.load %arg2[%c0, %c0_1, %c0_2] : memref<8x2x4xf32, #tpu.memory_space<vmem>>, vector<8x2x4xf32>
    %4 = vector.shape_cast %3 : vector<8x2x4xf32> to vector<16x4xf32>
    %c0_3 = arith.constant 0 : index
    %c0_4 = arith.constant 0 : index
    %5 = vector.load %arg4[%c0_3, %c0_4] : memref<4x128xf32, #tpu.memory_space<vmem>>, vector<4x128xf32>
    %cst = arith.constant dense<0.000000e+00> : vector<16x128xf32>
    %6 = tpu.matmul %4, %5, %cst {dimension_numbers = #tpu.dot_dimension_numbers<[1], [0], [0], [1], [0, 0, 1, 1], [], []>} : vector<16x4xf32>, vector<4x128xf32>, vector<16x128xf32> -> vector<16x128xf32>
    %c0_5 = arith.constant 0 : index
    %c0_6 = arith.constant 0 : index
    %7 = vector.load %arg6[%c0_5, %c0_6] : memref<1x128xf32, #tpu.memory_space<vmem>>, vector<1x128xf32>
    %8 = vector.broadcast %7 : vector<1x128xf32> to vector<16x128xf32>
    %9 = arith.addf %6, %8 : vector<16x128xf32>
    %10 = vector.shape_cast %9 : vector<16x128xf32> to vector<8x2x128xf32>
    %c0_7 = arith.constant 0 : index
    %c0_8 = arith.constant 0 : index
    %c0_9 = arith.constant 0 : index
    %11 = vector.load %arg16[%c0_7, %c0_8, %c0_9] : memref<8x2x128xf32, #tpu.memory_space<vmem>>, vector<8x2x128xf32>
    tpu.vector_store %arg16[%c0_7, %c0_8, %c0_9], %10 {strides = array<i32>} : memref<8x2x128xf32, #tpu.memory_space<vmem>>, vector<8x2x128xf32>,
    %c0_10 = arith.constant 0 : index
    %c0_11 = arith.constant 0 : index
    %12 = vector.load %arg5[%c0_10, %c0_11] : memref<32x128xf32, #tpu.memory_space<vmem>>, vector<32x128xf32>
    %c0_12 = arith.constant 0 : index
    %c0_13 = arith.constant 0 : index
    %13 = vector.load %arg7[%c0_12, %c0_13] : memref<64x128xf32, #tpu.memory_space<vmem>>, vector<64x128xf32>
    %c0_14 = arith.constant 0 : index
    %c0_15 = arith.constant 0 : index
    %14 = vector.load %arg8[%c0_14, %c0_15] : memref<1x128xf32, #tpu.memory_space<vmem>>, vector<1x128xf32>
    %c0_16 = arith.constant 0 : index
    %c0_17 = arith.constant 0 : index
    %15 = vector.load %arg11[%c0_16, %c0_17] : memref<1x32xf32, #tpu.memory_space<vmem>>, vector<1x32xf32>
    %16 = tpu.iota {dimensions = array<i32: 1>} : vector<2x8xi32>
    %c0_18 = arith.constant 0 : index
    %c0_19 = arith.constant 0 : index
    %c0_20 = arith.constant 0 : index
    %17 = vector.load %arg14[%c0_18, %c0_19, %c0_20] : memref<2x2x32xf32, #tpu.memory_space<vmem>>, vector<1x2x32xf32>
    %18 = vector.shape_cast %17 : vector<1x2x32xf32> to vector<2x32xf32>
    %c1 = arith.constant 1 : index
    %c0_21 = arith.constant 0 : index
    %c0_22 = arith.constant 0 : index
    %19 = vector.load %arg14[%c1, %c0_21, %c0_22] : memref<2x2x32xf32, #tpu.memory_space<vmem>>, vector<1x2x32xf32>
    %20 = vector.shape_cast %19 : vector<1x2x32xf32> to vector<2x32xf32>
    %c0_23 = arith.constant 0 : index
    %c0_24 = arith.constant 0 : index
    %c0_25 = arith.constant 0 : index
    %21 = vector.load %arg15[%c0_23, %c0_24, %c0_25] : memref<2x2x32xf32, #tpu.memory_space<vmem>>, vector<1x2x32xf32>
    %22 = vector.shape_cast %21 : vector<1x2x32xf32> to vector<2x32xf32>
    %c1_26 = arith.constant 1 : index
    %c0_27 = arith.constant 0 : index
    %c0_28 = arith.constant 0 : index
    %23 = vector.load %arg15[%c1_26, %c0_27, %c0_28] : memref<2x2x32xf32, #tpu.memory_space<vmem>>, vector<1x2x32xf32>
    %24 = vector.shape_cast %23 : vector<1x2x32xf32> to vector<2x32xf32>
    %cst_29 = arith.constant 0.000000e+00 : f32
    %25 = vector.broadcast %cst_29 : f32 to vector<2x8xf32>
    %c0_i32_30 = arith.constant 0 : i32
    %26 = arith.index_cast %c0_i32_30 : i32 to index
    %c0_31 = arith.constant 0 : index
    %c0_32 = arith.constant 0 : index
    %27 = vector.load %arg16[%26, %c0_31, %c0_32] : memref<8x2x128xf32, #tpu.memory_space<vmem>>, vector<1x2x128xf32>
    %28 = vector.shape_cast %27 : vector<1x2x128xf32> to vector<2x128xf32>
    %cst_33 = arith.constant dense<0.000000e+00> : vector<2x128xf32>
    %29 = tpu.matmul %18, %12, %cst_33 {dimension_numbers = #tpu.dot_dimension_numbers<[1], [0], [0], [1], [0, 0, 1, 1], [], []>} : vector<2x32xf32>, vector<32x128xf32>, vector<2x128xf32> -> vector<2x128xf32>
    %30 = arith.addf %28, %29 : vector<2x128xf32>
    %31 = vector.extract_strided_slice %30 {offsets = [0, 0], sizes = [2, 96], strides = [1, 1]} : vector<2x128xf32> to vector<2x96xf32>
    %32 = arith.negf %31 : vector<2x96xf32>
    %33 = math.exp %32 : vector<2x96xf32>
    %cst_34 = arith.constant 1.000000e+00 : f32
    %34 = vector.broadcast %cst_34 : f32 to vector<2x96xf32>
    %35 = arith.addf %34, %33 : vector<2x96xf32>
    %36 = arith.divf %34, %35 : vector<2x96xf32>
    %37 = vector.extract_strided_slice %30 {offsets = [0, 96], sizes = [2, 32], strides = [1, 1]} : vector<2x128xf32> to vector<2x32xf32>
    %38 = math.tanh %37 : vector<2x32xf32>
    %39 = vector.extract_strided_slice %36 {offsets = [0, 0], sizes = [2, 32], strides = [1, 1]} : vector<2x96xf32> to vector<2x32xf32>
    %40 = vector.extract_strided_slice %36 {offsets = [0, 32], sizes = [2, 32], strides = [1, 1]} : vector<2x96xf32> to vector<2x32xf32>
    %41 = vector.extract_strided_slice %36 {offsets = [0, 64], sizes = [2, 32], strides = [1, 1]} : vector<2x96xf32> to vector<2x32xf32>
    %42 = arith.mulf %40, %22 : vector<2x32xf32>
    %43 = arith.mulf %39, %38 : vector<2x32xf32>
    %44 = arith.addf %42, %43 : vector<2x32xf32>
    %45 = math.tanh %44 : vector<2x32xf32>
    %46 = arith.mulf %41, %45 : vector<2x32xf32>
    %47 = tpu.concatenate %46, %20 in 1 : vector<2x32xf32>, vector<2x32xf32> -> vector<2x64xf32>
    %cst_35 = arith.constant dense<0.000000e+00> : vector<2x128xf32>
    %48 = tpu.matmul %47, %13, %cst_35 {dimension_numbers = #tpu.dot_dimension_numbers<[1], [0], [0], [1], [0, 0, 1, 1], [], []>} : vector<2x64xf32>, vector<64x128xf32>, vector<2x128xf32> -> vector<2x128xf32>
    %49 = vector.broadcast %14 : vector<1x128xf32> to vector<2x128xf32>
    %50 = arith.addf %48, %49 : vector<2x128xf32>
    %51 = vector.extract_strided_slice %50 {offsets = [0, 0], sizes = [2, 96], strides = [1, 1]} : vector<2x128xf32> to vector<2x96xf32>
    %52 = arith.negf %51 : vector<2x96xf32>
    %53 = math.exp %52 : vector<2x96xf32>
    %cst_36 = arith.constant 1.000000e+00 : f32
    %54 = vector.broadcast %cst_36 : f32 to vector<2x96xf32>
    %55 = arith.addf %54, %53 : vector<2x96xf32>
    %56 = arith.divf %54, %55 : vector<2x96xf32>
    %57 = vector.extract_strided_slice %50 {offsets = [0, 96], sizes = [2, 32], strides = [1, 1]} : vector<2x128xf32> to vector<2x32xf32>
    %58 = math.tanh %57 : vector<2x32xf32>
    %59 = vector.extract_strided_slice %56 {offsets = [0, 0], sizes = [2, 32], strides = [1, 1]} : vector<2x96xf32> to vector<2x32xf32>
    %60 = vector.extract_strided_slice %56 {offsets = [0, 32], sizes = [2, 32], strides = [1, 1]} : vector<2x96xf32> to vector<2x32xf32>
    %61 = vector.extract_strided_slice %56 {offsets = [0, 64], sizes = [2, 32], strides = [1, 1]} : vector<2x96xf32> to vector<2x32xf32>
    %62 = arith.mulf %60, %24 : vector<2x32xf32>
    %63 = arith.mulf %59, %58 : vector<2x32xf32>
    %64 = arith.addf %62, %63 : vector<2x32xf32>
    %65 = math.tanh %64 : vector<2x32xf32>
    %66 = arith.mulf %61, %65 : vector<2x32xf32>
    %67 = arith.index_cast %c0_i32_30 : i32 to index
    %c0_37 = arith.constant 0 : index
    %c0_38 = arith.constant 0 : index
    %68 = vector.load %arg3[%67, %c0_37, %c0_38] : memref<8x2x32xbf16, #tpu.memory_space<vmem>>, vector<1x2x32xbf16>
    %69 = vector.shape_cast %68 : vector<1x2x32xbf16> to vector<2x32xbf16>
    %70 = arith.extf %69 : vector<2x32xbf16> to vector<2x32xf32>
    %71 = arith.mulf %66, %70 : vector<2x32xf32>
    %72 = vector.broadcast %15 : vector<1x32xf32> to vector<2x32xf32>
    %73 = arith.mulf %71, %72 : vector<2x32xf32>
    %cst_39 = arith.constant dense<0.000000e+00> : vector<2xf32>
    %74 = vector.multi_reduction <add>, %73, %cst_39 [1] : vector<2x32xf32> to vector<2xf32>
    %75 = vector.shape_cast %74 : vector<2xf32> to vector<2x1xf32>
    %76 = vector.broadcast %c0_i32_30 : i32 to vector<2x8xi32>
    %77 = arith.cmpi eq, %16, %76 : vector<2x8xi32>
    %78 = vector.shape_cast %75 : vector<2x1xf32> to vector<2x1xf32>
    %79 = vector.broadcast %78 : vector<2x1xf32> to vector<2x8xf32>
    %80 = arith.select %77, %79, %25 : vector<2x8xi1>, vector<2x8xf32>
    %c1_i32 = arith.constant 1 : i32
    %81 = arith.index_cast %c1_i32 : i32 to index
    %c0_40 = arith.constant 0 : index
    %c0_41 = arith.constant 0 : index
    %82 = vector.load %arg16[%81, %c0_40, %c0_41] : memref<8x2x128xf32, #tpu.memory_space<vmem>>, vector<1x2x128xf32>
    %83 = vector.shape_cast %82 : vector<1x2x128xf32> to vector<2x128xf32>
    %cst_42 = arith.constant dense<0.000000e+00> : vector<2x128xf32>
    %84 = tpu.matmul %46, %12, %cst_42 {dimension_numbers = #tpu.dot_dimension_numbers<[1], [0], [0], [1], [0, 0, 1, 1], [], []>} : vector<2x32xf32>, vector<32x128xf32>, vector<2x128xf32> -> vector<2x128xf32>
    %85 = arith.addf %83, %84 : vector<2x128xf32>
    %86 = vector.extract_strided_slice %85 {offsets = [0, 0], sizes = [2, 96], strides = [1, 1]} : vector<2x128xf32> to vector<2x96xf32>
    %87 = arith.negf %86 : vector<2x96xf32>
    %88 = math.exp %87 : vector<2x96xf32>
    %cst_43 = arith.constant 1.000000e+00 : f32
    %89 = vector.broadcast %cst_43 : f32 to vector<2x96xf32>
    %90 = arith.addf %89, %88 : vector<2x96xf32>
    %91 = arith.divf %89, %90 : vector<2x96xf32>
    %92 = vector.extract_strided_slice %85 {offsets = [0, 96], sizes = [2, 32], strides = [1, 1]} : vector<2x128xf32> to vector<2x32xf32>
    %93 = math.tanh %92 : vector<2x32xf32>
    %94 = vector.extract_strided_slice %91 {offsets = [0, 0], sizes = [2, 32], strides = [1, 1]} : vector<2x96xf32> to vector<2x32xf32>
    %95 = vector.extract_strided_slice %91 {offsets = [0, 32], sizes = [2, 32], strides = [1, 1]} : vector<2x96xf32> to vector<2x32xf32>
    %96 = vector.extract_strided_slice %91 {offsets = [0, 64], sizes = [2, 32], strides = [1, 1]} : vector<2x96xf32> to vector<2x32xf32>
    %97 = arith.mulf %95, %44 : vector<2x32xf32>
    %98 = arith.mulf %94, %93 : vector<2x32xf32>
    %99 = arith.addf %97, %98 : vector<2x32xf32>
    %100 = math.tanh %99 : vector<2x32xf32>
    %101 = arith.mulf %96, %100 : vector<2x32xf32>
    %102 = tpu.concatenate %101, %66 in 1 : vector<2x32xf32>, vector<2x32xf32> -> vector<2x64xf32>
    %cst_44 = arith.constant dense<0.000000e+00> : vector<2x128xf32>
    %103 = tpu.matmul %102, %13, %cst_44 {dimension_numbers = #tpu.dot_dimension_numbers<[1], [0], [0], [1], [0, 0, 1, 1], [], []>} : vector<2x64xf32>, vector<64x128xf32>, vector<2x128xf32> -> vector<2x128xf32>
    %104 = vector.broadcast %14 : vector<1x128xf32> to vector<2x128xf32>
    %105 = arith.addf %103, %104 : vector<2x128xf32>
    %106 = vector.extract_strided_slice %105 {offsets = [0, 0], sizes = [2, 96], strides = [1, 1]} : vector<2x128xf32> to vector<2x96xf32>
    %107 = arith.negf %106 : vector<2x96xf32>
    %108 = math.exp %107 : vector<2x96xf32>
    %cst_45 = arith.constant 1.000000e+00 : f32
    %109 = vector.broadcast %cst_45 : f32 to vector<2x96xf32>
    %110 = arith.addf %109, %108 : vector<2x96xf32>
    %111 = arith.divf %109, %110 : vector<2x96xf32>
    %112 = vector.extract_strided_slice %105 {offsets = [0, 96], sizes = [2, 32], strides = [1, 1]} : vector<2x128xf32> to vector<2x32xf32>
    %113 = math.tanh %112 : vector<2x32xf32>
    %114 = vector.extract_strided_slice %111 {offsets = [0, 0], sizes = [2, 32], strides = [1, 1]} : vector<2x96xf32> to vector<2x32xf32>
    %115 = vector.extract_strided_slice %111 {offsets = [0, 32], sizes = [2, 32], strides = [1, 1]} : vector<2x96xf32> to vector<2x32xf32>
    %116 = vector.extract_strided_slice %111 {offsets = [0, 64], sizes = [2, 32], strides = [1, 1]} : vector<2x96xf32> to vector<2x32xf32>
    %117 = arith.mulf %115, %64 : vector<2x32xf32>
    %118 = arith.mulf %114, %113 : vector<2x32xf32>
    %119 = arith.addf %117, %118 : vector<2x32xf32>
    %120 = math.tanh %119 : vector<2x32xf32>
    %121 = arith.mulf %116, %120 : vector<2x32xf32>
    %122 = arith.index_cast %c1_i32 : i32 to index
    %c0_46 = arith.constant 0 : index
    %c0_47 = arith.constant 0 : index
    %123 = vector.load %arg3[%122, %c0_46, %c0_47] : memref<8x2x32xbf16, #tpu.memory_space<vmem>>, vector<1x2x32xbf16>
    %124 = vector.shape_cast %123 : vector<1x2x32xbf16> to vector<2x32xbf16>
    %125 = arith.extf %124 : vector<2x32xbf16> to vector<2x32xf32>
    %126 = arith.mulf %121, %125 : vector<2x32xf32>
    %127 = vector.broadcast %15 : vector<1x32xf32> to vector<2x32xf32>
    %128 = arith.mulf %126, %127 : vector<2x32xf32>
    %cst_48 = arith.constant dense<0.000000e+00> : vector<2xf32>
    %129 = vector.multi_reduction <add>, %128, %cst_48 [1] : vector<2x32xf32> to vector<2xf32>
    %130 = vector.shape_cast %129 : vector<2xf32> to vector<2x1xf32>
    %131 = vector.broadcast %c1_i32 : i32 to vector<2x8xi32>
    %132 = arith.cmpi eq, %16, %131 : vector<2x8xi32>
    %133 = vector.shape_cast %130 : vector<2x1xf32> to vector<2x1xf32>
    %134 = vector.broadcast %133 : vector<2x1xf32> to vector<2x8xf32>
    %135 = arith.select %132, %134, %80 : vector<2x8xi1>, vector<2x8xf32>
    %c2_i32 = arith.constant 2 : i32
    %136 = arith.index_cast %c2_i32 : i32 to index
    %c0_49 = arith.constant 0 : index
    %c0_50 = arith.constant 0 : index
    %137 = vector.load %arg16[%136, %c0_49, %c0_50] : memref<8x2x128xf32, #tpu.memory_space<vmem>>, vector<1x2x128xf32>
    %138 = vector.shape_cast %137 : vector<1x2x128xf32> to vector<2x128xf32>
    %cst_51 = arith.constant dense<0.000000e+00> : vector<2x128xf32>
    %139 = tpu.matmul %101, %12, %cst_51 {dimension_numbers = #tpu.dot_dimension_numbers<[1], [0], [0], [1], [0, 0, 1, 1], [], []>} : vector<2x32xf32>, vector<32x128xf32>, vector<2x128xf32> -> vector<2x128xf32>
    %140 = arith.addf %138, %139 : vector<2x128xf32>
    %141 = vector.extract_strided_slice %140 {offsets = [0, 0], sizes = [2, 96], strides = [1, 1]} : vector<2x128xf32> to vector<2x96xf32>
    %142 = arith.negf %141 : vector<2x96xf32>
    %143 = math.exp %142 : vector<2x96xf32>
    %cst_52 = arith.constant 1.000000e+00 : f32
    %144 = vector.broadcast %cst_52 : f32 to vector<2x96xf32>
    %145 = arith.addf %144, %143 : vector<2x96xf32>
    %146 = arith.divf %144, %145 : vector<2x96xf32>
    %147 = vector.extract_strided_slice %140 {offsets = [0, 96], sizes = [2, 32], strides = [1, 1]} : vector<2x128xf32> to vector<2x32xf32>
    %148 = math.tanh %147 : vector<2x32xf32>
    %149 = vector.extract_strided_slice %146 {offsets = [0, 0], sizes = [2, 32], strides = [1, 1]} : vector<2x96xf32> to vector<2x32xf32>
    %150 = vector.extract_strided_slice %146 {offsets = [0, 32], sizes = [2, 32], strides = [1, 1]} : vector<2x96xf32> to vector<2x32xf32>
    %151 = vector.extract_strided_slice %146 {offsets = [0, 64], sizes = [2, 32], strides = [1, 1]} : vector<2x96xf32> to vector<2x32xf32>
    %152 = arith.mulf %150, %99 : vector<2x32xf32>
    %153 = arith.mulf %149, %148 : vector<2x32xf32>
    %154 = arith.addf %152, %153 : vector<2x32xf32>
    %155 = math.tanh %154 : vector<2x32xf32>
    %156 = arith.mulf %151, %155 : vector<2x32xf32>
    %157 = tpu.concatenate %156, %121 in 1 : vector<2x32xf32>, vector<2x32xf32> -> vector<2x64xf32>
    %cst_53 = arith.constant dense<0.000000e+00> : vector<2x128xf32>
    %158 = tpu.matmul %157, %13, %cst_53 {dimension_numbers = #tpu.dot_dimension_numbers<[1], [0], [0], [1], [0, 0, 1, 1], [], []>} : vector<2x64xf32>, vector<64x128xf32>, vector<2x128xf32> -> vector<2x128xf32>
    %159 = vector.broadcast %14 : vector<1x128xf32> to vector<2x128xf32>
    %160 = arith.addf %158, %159 : vector<2x128xf32>
    %161 = vector.extract_strided_slice %160 {offsets = [0, 0], sizes = [2, 96], strides = [1, 1]} : vector<2x128xf32> to vector<2x96xf32>
    %162 = arith.negf %161 : vector<2x96xf32>
    %163 = math.exp %162 : vector<2x96xf32>
    %cst_54 = arith.constant 1.000000e+00 : f32
    %164 = vector.broadcast %cst_54 : f32 to vector<2x96xf32>
    %165 = arith.addf %164, %163 : vector<2x96xf32>
    %166 = arith.divf %164, %165 : vector<2x96xf32>
    %167 = vector.extract_strided_slice %160 {offsets = [0, 96], sizes = [2, 32], strides = [1, 1]} : vector<2x128xf32> to vector<2x32xf32>
    %168 = math.tanh %167 : vector<2x32xf32>
    %169 = vector.extract_strided_slice %166 {offsets = [0, 0], sizes = [2, 32], strides = [1, 1]} : vector<2x96xf32> to vector<2x32xf32>
    %170 = vector.extract_strided_slice %166 {offsets = [0, 32], sizes = [2, 32], strides = [1, 1]} : vector<2x96xf32> to vector<2x32xf32>
    %171 = vector.extract_strided_slice %166 {offsets = [0, 64], sizes = [2, 32], strides = [1, 1]} : vector<2x96xf32> to vector<2x32xf32>
    %172 = arith.mulf %170, %119 : vector<2x32xf32>
    %173 = arith.mulf %169, %168 : vector<2x32xf32>
    %174 = arith.addf %172, %173 : vector<2x32xf32>
    %175 = math.tanh %174 : vector<2x32xf32>
    %176 = arith.mulf %171, %175 : vector<2x32xf32>
    %177 = arith.index_cast %c2_i32 : i32 to index
    %c0_55 = arith.constant 0 : index
    %c0_56 = arith.constant 0 : index
    %178 = vector.load %arg3[%177, %c0_55, %c0_56] : memref<8x2x32xbf16, #tpu.memory_space<vmem>>, vector<1x2x32xbf16>
    %179 = vector.shape_cast %178 : vector<1x2x32xbf16> to vector<2x32xbf16>
    %180 = arith.extf %179 : vector<2x32xbf16> to vector<2x32xf32>
    %181 = arith.mulf %176, %180 : vector<2x32xf32>
    %182 = vector.broadcast %15 : vector<1x32xf32> to vector<2x32xf32>
    %183 = arith.mulf %181, %182 : vector<2x32xf32>
    %cst_57 = arith.constant dense<0.000000e+00> : vector<2xf32>
    %184 = vector.multi_reduction <add>, %183, %cst_57 [1] : vector<2x32xf32> to vector<2xf32>
    %185 = vector.shape_cast %184 : vector<2xf32> to vector<2x1xf32>
    %186 = vector.broadcast %c2_i32 : i32 to vector<2x8xi32>
    %187 = arith.cmpi eq, %16, %186 : vector<2x8xi32>
    %188 = vector.shape_cast %185 : vector<2x1xf32> to vector<2x1xf32>
    %189 = vector.broadcast %188 : vector<2x1xf32> to vector<2x8xf32>
    %190 = arith.select %187, %189, %135 : vector<2x8xi1>, vector<2x8xf32>
    %c3_i32 = arith.constant 3 : i32
    %191 = arith.index_cast %c3_i32 : i32 to index
    %c0_58 = arith.constant 0 : index
    %c0_59 = arith.constant 0 : index
    %192 = vector.load %arg16[%191, %c0_58, %c0_59] : memref<8x2x128xf32, #tpu.memory_space<vmem>>, vector<1x2x128xf32>
    %193 = vector.shape_cast %192 : vector<1x2x128xf32> to vector<2x128xf32>
    %cst_60 = arith.constant dense<0.000000e+00> : vector<2x128xf32>
    %194 = tpu.matmul %156, %12, %cst_60 {dimension_numbers = #tpu.dot_dimension_numbers<[1], [0], [0], [1], [0, 0, 1, 1], [], []>} : vector<2x32xf32>, vector<32x128xf32>, vector<2x128xf32> -> vector<2x128xf32>
    %195 = arith.addf %193, %194 : vector<2x128xf32>
    %196 = vector.extract_strided_slice %195 {offsets = [0, 0], sizes = [2, 96], strides = [1, 1]} : vector<2x128xf32> to vector<2x96xf32>
    %197 = arith.negf %196 : vector<2x96xf32>
    %198 = math.exp %197 : vector<2x96xf32>
    %cst_61 = arith.constant 1.000000e+00 : f32
    %199 = vector.broadcast %cst_61 : f32 to vector<2x96xf32>
    %200 = arith.addf %199, %198 : vector<2x96xf32>
    %201 = arith.divf %199, %200 : vector<2x96xf32>
    %202 = vector.extract_strided_slice %195 {offsets = [0, 96], sizes = [2, 32], strides = [1, 1]} : vector<2x128xf32> to vector<2x32xf32>
    %203 = math.tanh %202 : vector<2x32xf32>
    %204 = vector.extract_strided_slice %201 {offsets = [0, 0], sizes = [2, 32], strides = [1, 1]} : vector<2x96xf32> to vector<2x32xf32>
    %205 = vector.extract_strided_slice %201 {offsets = [0, 32], sizes = [2, 32], strides = [1, 1]} : vector<2x96xf32> to vector<2x32xf32>
    %206 = vector.extract_strided_slice %201 {offsets = [0, 64], sizes = [2, 32], strides = [1, 1]} : vector<2x96xf32> to vector<2x32xf32>
    %207 = arith.mulf %205, %154 : vector<2x32xf32>
    %208 = arith.mulf %204, %203 : vector<2x32xf32>
    %209 = arith.addf %207, %208 : vector<2x32xf32>
    %210 = math.tanh %209 : vector<2x32xf32>
    %211 = arith.mulf %206, %210 : vector<2x32xf32>
    %212 = tpu.concatenate %211, %176 in 1 : vector<2x32xf32>, vector<2x32xf32> -> vector<2x64xf32>
    %cst_62 = arith.constant dense<0.000000e+00> : vector<2x128xf32>
    %213 = tpu.matmul %212, %13, %cst_62 {dimension_numbers = #tpu.dot_dimension_numbers<[1], [0], [0], [1], [0, 0, 1, 1], [], []>} : vector<2x64xf32>, vector<64x128xf32>, vector<2x128xf32> -> vector<2x128xf32>
    %214 = vector.broadcast %14 : vector<1x128xf32> to vector<2x128xf32>
    %215 = arith.addf %213, %214 : vector<2x128xf32>
    %216 = vector.extract_strided_slice %215 {offsets = [0, 0], sizes = [2, 96], strides = [1, 1]} : vector<2x128xf32> to vector<2x96xf32>
    %217 = arith.negf %216 : vector<2x96xf32>
    %218 = math.exp %217 : vector<2x96xf32>
    %cst_63 = arith.constant 1.000000e+00 : f32
    %219 = vector.broadcast %cst_63 : f32 to vector<2x96xf32>
    %220 = arith.addf %219, %218 : vector<2x96xf32>
    %221 = arith.divf %219, %220 : vector<2x96xf32>
    %222 = vector.extract_strided_slice %215 {offsets = [0, 96], sizes = [2, 32], strides = [1, 1]} : vector<2x128xf32> to vector<2x32xf32>
    %223 = math.tanh %222 : vector<2x32xf32>
    %224 = vector.extract_strided_slice %221 {offsets = [0, 0], sizes = [2, 32], strides = [1, 1]} : vector<2x96xf32> to vector<2x32xf32>
    %225 = vector.extract_strided_slice %221 {offsets = [0, 32], sizes = [2, 32], strides = [1, 1]} : vector<2x96xf32> to vector<2x32xf32>
    %226 = vector.extract_strided_slice %221 {offsets = [0, 64], sizes = [2, 32], strides = [1, 1]} : vector<2x96xf32> to vector<2x32xf32>
    %227 = arith.mulf %225, %174 : vector<2x32xf32>
    %228 = arith.mulf %224, %223 : vector<2x32xf32>
    %229 = arith.addf %227, %228 : vector<2x32xf32>
    %230 = math.tanh %229 : vector<2x32xf32>
    %231 = arith.mulf %226, %230 : vector<2x32xf32>
    %232 = arith.index_cast %c3_i32 : i32 to index
    %c0_64 = arith.constant 0 : index
    %c0_65 = arith.constant 0 : index
    %233 = vector.load %arg3[%232, %c0_64, %c0_65] : memref<8x2x32xbf16, #tpu.memory_space<vmem>>, vector<1x2x32xbf16>
    %234 = vector.shape_cast %233 : vector<1x2x32xbf16> to vector<2x32xbf16>
    %235 = arith.extf %234 : vector<2x32xbf16> to vector<2x32xf32>
    %236 = arith.mulf %231, %235 : vector<2x32xf32>
    %237 = vector.broadcast %15 : vector<1x32xf32> to vector<2x32xf32>
    %238 = arith.mulf %236, %237 : vector<2x32xf32>
    %cst_66 = arith.constant dense<0.000000e+00> : vector<2xf32>
    %239 = vector.multi_reduction <add>, %238, %cst_66 [1] : vector<2x32xf32> to vector<2xf32>
    %240 = vector.shape_cast %239 : vector<2xf32> to vector<2x1xf32>
    %241 = vector.broadcast %c3_i32 : i32 to vector<2x8xi32>
    %242 = arith.cmpi eq, %16, %241 : vector<2x8xi32>
    %243 = vector.shape_cast %240 : vector<2x1xf32> to vector<2x1xf32>
    %244 = vector.broadcast %243 : vector<2x1xf32> to vector<2x8xf32>
    %245 = arith.select %242, %244, %190 : vector<2x8xi1>, vector<2x8xf32>
    %c4_i32 = arith.constant 4 : i32
    %246 = arith.index_cast %c4_i32 : i32 to index
    %c0_67 = arith.constant 0 : index
    %c0_68 = arith.constant 0 : index
    %247 = vector.load %arg16[%246, %c0_67, %c0_68] : memref<8x2x128xf32, #tpu.memory_space<vmem>>, vector<1x2x128xf32>
    %248 = vector.shape_cast %247 : vector<1x2x128xf32> to vector<2x128xf32>
    %cst_69 = arith.constant dense<0.000000e+00> : vector<2x128xf32>
    %249 = tpu.matmul %211, %12, %cst_69 {dimension_numbers = #tpu.dot_dimension_numbers<[1], [0], [0], [1], [0, 0, 1, 1], [], []>} : vector<2x32xf32>, vector<32x128xf32>, vector<2x128xf32> -> vector<2x128xf32>
    %250 = arith.addf %248, %249 : vector<2x128xf32>
    %251 = vector.extract_strided_slice %250 {offsets = [0, 0], sizes = [2, 96], strides = [1, 1]} : vector<2x128xf32> to vector<2x96xf32>
    %252 = arith.negf %251 : vector<2x96xf32>
    %253 = math.exp %252 : vector<2x96xf32>
    %cst_70 = arith.constant 1.000000e+00 : f32
    %254 = vector.broadcast %cst_70 : f32 to vector<2x96xf32>
    %255 = arith.addf %254, %253 : vector<2x96xf32>
    %256 = arith.divf %254, %255 : vector<2x96xf32>
    %257 = vector.extract_strided_slice %250 {offsets = [0, 96], sizes = [2, 32], strides = [1, 1]} : vector<2x128xf32> to vector<2x32xf32>
    %258 = math.tanh %257 : vector<2x32xf32>
    %259 = vector.extract_strided_slice %256 {offsets = [0, 0], sizes = [2, 32], strides = [1, 1]} : vector<2x96xf32> to vector<2x32xf32>
    %260 = vector.extract_strided_slice %256 {offsets = [0, 32], sizes = [2, 32], strides = [1, 1]} : vector<2x96xf32> to vector<2x32xf32>
    %261 = vector.extract_strided_slice %256 {offsets = [0, 64], sizes = [2, 32], strides = [1, 1]} : vector<2x96xf32> to vector<2x32xf32>
    %262 = arith.mulf %260, %209 : vector<2x32xf32>
    %263 = arith.mulf %259, %258 : vector<2x32xf32>
    %264 = arith.addf %262, %263 : vector<2x32xf32>
    %265 = math.tanh %264 : vector<2x32xf32>
    %266 = arith.mulf %261, %265 : vector<2x32xf32>
    %267 = tpu.concatenate %266, %231 in 1 : vector<2x32xf32>, vector<2x32xf32> -> vector<2x64xf32>
    %cst_71 = arith.constant dense<0.000000e+00> : vector<2x128xf32>
    %268 = tpu.matmul %267, %13, %cst_71 {dimension_numbers = #tpu.dot_dimension_numbers<[1], [0], [0], [1], [0, 0, 1, 1], [], []>} : vector<2x64xf32>, vector<64x128xf32>, vector<2x128xf32> -> vector<2x128xf32>
    %269 = vector.broadcast %14 : vector<1x128xf32> to vector<2x128xf32>
    %270 = arith.addf %268, %269 : vector<2x128xf32>
    %271 = vector.extract_strided_slice %270 {offsets = [0, 0], sizes = [2, 96], strides = [1, 1]} : vector<2x128xf32> to vector<2x96xf32>
    %272 = arith.negf %271 : vector<2x96xf32>
    %273 = math.exp %272 : vector<2x96xf32>
    %cst_72 = arith.constant 1.000000e+00 : f32
    %274 = vector.broadcast %cst_72 : f32 to vector<2x96xf32>
    %275 = arith.addf %274, %273 : vector<2x96xf32>
    %276 = arith.divf %274, %275 : vector<2x96xf32>
    %277 = vector.extract_strided_slice %270 {offsets = [0, 96], sizes = [2, 32], strides = [1, 1]} : vector<2x128xf32> to vector<2x32xf32>
    %278 = math.tanh %277 : vector<2x32xf32>
    %279 = vector.extract_strided_slice %276 {offsets = [0, 0], sizes = [2, 32], strides = [1, 1]} : vector<2x96xf32> to vector<2x32xf32>
    %280 = vector.extract_strided_slice %276 {offsets = [0, 32], sizes = [2, 32], strides = [1, 1]} : vector<2x96xf32> to vector<2x32xf32>
    %281 = vector.extract_strided_slice %276 {offsets = [0, 64], sizes = [2, 32], strides = [1, 1]} : vector<2x96xf32> to vector<2x32xf32>
    %282 = arith.mulf %280, %229 : vector<2x32xf32>
    %283 = arith.mulf %279, %278 : vector<2x32xf32>
    %284 = arith.addf %282, %283 : vector<2x32xf32>
    %285 = math.tanh %284 : vector<2x32xf32>
    %286 = arith.mulf %281, %285 : vector<2x32xf32>
    %287 = arith.index_cast %c4_i32 : i32 to index
    %c0_73 = arith.constant 0 : index
    %c0_74 = arith.constant 0 : index
    %288 = vector.load %arg3[%287, %c0_73, %c0_74] : memref<8x2x32xbf16, #tpu.memory_space<vmem>>, vector<1x2x32xbf16>
    %289 = vector.shape_cast %288 : vector<1x2x32xbf16> to vector<2x32xbf16>
    %290 = arith.extf %289 : vector<2x32xbf16> to vector<2x32xf32>
    %291 = arith.mulf %286, %290 : vector<2x32xf32>
    %292 = vector.broadcast %15 : vector<1x32xf32> to vector<2x32xf32>
    %293 = arith.mulf %291, %292 : vector<2x32xf32>
    %cst_75 = arith.constant dense<0.000000e+00> : vector<2xf32>
    %294 = vector.multi_reduction <add>, %293, %cst_75 [1] : vector<2x32xf32> to vector<2xf32>
    %295 = vector.shape_cast %294 : vector<2xf32> to vector<2x1xf32>
    %296 = vector.broadcast %c4_i32 : i32 to vector<2x8xi32>
    %297 = arith.cmpi eq, %16, %296 : vector<2x8xi32>
    %298 = vector.shape_cast %295 : vector<2x1xf32> to vector<2x1xf32>
    %299 = vector.broadcast %298 : vector<2x1xf32> to vector<2x8xf32>
    %300 = arith.select %297, %299, %245 : vector<2x8xi1>, vector<2x8xf32>
    %c5_i32 = arith.constant 5 : i32
    %301 = arith.index_cast %c5_i32 : i32 to index
    %c0_76 = arith.constant 0 : index
    %c0_77 = arith.constant 0 : index
    %302 = vector.load %arg16[%301, %c0_76, %c0_77] : memref<8x2x128xf32, #tpu.memory_space<vmem>>, vector<1x2x128xf32>
    %303 = vector.shape_cast %302 : vector<1x2x128xf32> to vector<2x128xf32>
    %cst_78 = arith.constant dense<0.000000e+00> : vector<2x128xf32>
    %304 = tpu.matmul %266, %12, %cst_78 {dimension_numbers = #tpu.dot_dimension_numbers<[1], [0], [0], [1], [0, 0, 1, 1], [], []>} : vector<2x32xf32>, vector<32x128xf32>, vector<2x128xf32> -> vector<2x128xf32>
    %305 = arith.addf %303, %304 : vector<2x128xf32>
    %306 = vector.extract_strided_slice %305 {offsets = [0, 0], sizes = [2, 96], strides = [1, 1]} : vector<2x128xf32> to vector<2x96xf32>
    %307 = arith.negf %306 : vector<2x96xf32>
    %308 = math.exp %307 : vector<2x96xf32>
    %cst_79 = arith.constant 1.000000e+00 : f32
    %309 = vector.broadcast %cst_79 : f32 to vector<2x96xf32>
    %310 = arith.addf %309, %308 : vector<2x96xf32>
    %311 = arith.divf %309, %310 : vector<2x96xf32>
    %312 = vector.extract_strided_slice %305 {offsets = [0, 96], sizes = [2, 32], strides = [1, 1]} : vector<2x128xf32> to vector<2x32xf32>
    %313 = math.tanh %312 : vector<2x32xf32>
    %314 = vector.extract_strided_slice %311 {offsets = [0, 0], sizes = [2, 32], strides = [1, 1]} : vector<2x96xf32> to vector<2x32xf32>
    %315 = vector.extract_strided_slice %311 {offsets = [0, 32], sizes = [2, 32], strides = [1, 1]} : vector<2x96xf32> to vector<2x32xf32>
    %316 = vector.extract_strided_slice %311 {offsets = [0, 64], sizes = [2, 32], strides = [1, 1]} : vector<2x96xf32> to vector<2x32xf32>
    %317 = arith.mulf %315, %264 : vector<2x32xf32>
    %318 = arith.mulf %314, %313 : vector<2x32xf32>
    %319 = arith.addf %317, %318 : vector<2x32xf32>
    %320 = math.tanh %319 : vector<2x32xf32>
    %321 = arith.mulf %316, %320 : vector<2x32xf32>
    %322 = tpu.concatenate %321, %286 in 1 : vector<2x32xf32>, vector<2x32xf32> -> vector<2x64xf32>
    %cst_80 = arith.constant dense<0.000000e+00> : vector<2x128xf32>
    %323 = tpu.matmul %322, %13, %cst_80 {dimension_numbers = #tpu.dot_dimension_numbers<[1], [0], [0], [1], [0, 0, 1, 1], [], []>} : vector<2x64xf32>, vector<64x128xf32>, vector<2x128xf32> -> vector<2x128xf32>
    %324 = vector.broadcast %14 : vector<1x128xf32> to vector<2x128xf32>
    %325 = arith.addf %323, %324 : vector<2x128xf32>
    %326 = vector.extract_strided_slice %325 {offsets = [0, 0], sizes = [2, 96], strides = [1, 1]} : vector<2x128xf32> to vector<2x96xf32>
    %327 = arith.negf %326 : vector<2x96xf32>
    %328 = math.exp %327 : vector<2x96xf32>
    %cst_81 = arith.constant 1.000000e+00 : f32
    %329 = vector.broadcast %cst_81 : f32 to vector<2x96xf32>
    %330 = arith.addf %329, %328 : vector<2x96xf32>
    %331 = arith.divf %329, %330 : vector<2x96xf32>
    %332 = vector.extract_strided_slice %325 {offsets = [0, 96], sizes = [2, 32], strides = [1, 1]} : vector<2x128xf32> to vector<2x32xf32>
    %333 = math.tanh %332 : vector<2x32xf32>
    %334 = vector.extract_strided_slice %331 {offsets = [0, 0], sizes = [2, 32], strides = [1, 1]} : vector<2x96xf32> to vector<2x32xf32>
    %335 = vector.extract_strided_slice %331 {offsets = [0, 32], sizes = [2, 32], strides = [1, 1]} : vector<2x96xf32> to vector<2x32xf32>
    %336 = vector.extract_strided_slice %331 {offsets = [0, 64], sizes = [2, 32], strides = [1, 1]} : vector<2x96xf32> to vector<2x32xf32>
    %337 = arith.mulf %335, %284 : vector<2x32xf32>
    %338 = arith.mulf %334, %333 : vector<2x32xf32>
    %339 = arith.addf %337, %338 : vector<2x32xf32>
    %340 = math.tanh %339 : vector<2x32xf32>
    %341 = arith.mulf %336, %340 : vector<2x32xf32>
    %342 = arith.index_cast %c5_i32 : i32 to index
    %c0_82 = arith.constant 0 : index
    %c0_83 = arith.constant 0 : index
    %343 = vector.load %arg3[%342, %c0_82, %c0_83] : memref<8x2x32xbf16, #tpu.memory_space<vmem>>, vector<1x2x32xbf16>
    %344 = vector.shape_cast %343 : vector<1x2x32xbf16> to vector<2x32xbf16>
    %345 = arith.extf %344 : vector<2x32xbf16> to vector<2x32xf32>
    %346 = arith.mulf %341, %345 : vector<2x32xf32>
    %347 = vector.broadcast %15 : vector<1x32xf32> to vector<2x32xf32>
    %348 = arith.mulf %346, %347 : vector<2x32xf32>
    %cst_84 = arith.constant dense<0.000000e+00> : vector<2xf32>
    %349 = vector.multi_reduction <add>, %348, %cst_84 [1] : vector<2x32xf32> to vector<2xf32>
    %350 = vector.shape_cast %349 : vector<2xf32> to vector<2x1xf32>
    %351 = vector.broadcast %c5_i32 : i32 to vector<2x8xi32>
    %352 = arith.cmpi eq, %16, %351 : vector<2x8xi32>
    %353 = vector.shape_cast %350 : vector<2x1xf32> to vector<2x1xf32>
    %354 = vector.broadcast %353 : vector<2x1xf32> to vector<2x8xf32>
    %355 = arith.select %352, %354, %300 : vector<2x8xi1>, vector<2x8xf32>
    %c6_i32 = arith.constant 6 : i32
    %356 = arith.index_cast %c6_i32 : i32 to index
    %c0_85 = arith.constant 0 : index
    %c0_86 = arith.constant 0 : index
    %357 = vector.load %arg16[%356, %c0_85, %c0_86] : memref<8x2x128xf32, #tpu.memory_space<vmem>>, vector<1x2x128xf32>
    %358 = vector.shape_cast %357 : vector<1x2x128xf32> to vector<2x128xf32>
    %cst_87 = arith.constant dense<0.000000e+00> : vector<2x128xf32>
    %359 = tpu.matmul %321, %12, %cst_87 {dimension_numbers = #tpu.dot_dimension_numbers<[1], [0], [0], [1], [0, 0, 1, 1], [], []>} : vector<2x32xf32>, vector<32x128xf32>, vector<2x128xf32> -> vector<2x128xf32>
    %360 = arith.addf %358, %359 : vector<2x128xf32>
    %361 = vector.extract_strided_slice %360 {offsets = [0, 0], sizes = [2, 96], strides = [1, 1]} : vector<2x128xf32> to vector<2x96xf32>
    %362 = arith.negf %361 : vector<2x96xf32>
    %363 = math.exp %362 : vector<2x96xf32>
    %cst_88 = arith.constant 1.000000e+00 : f32
    %364 = vector.broadcast %cst_88 : f32 to vector<2x96xf32>
    %365 = arith.addf %364, %363 : vector<2x96xf32>
    %366 = arith.divf %364, %365 : vector<2x96xf32>
    %367 = vector.extract_strided_slice %360 {offsets = [0, 96], sizes = [2, 32], strides = [1, 1]} : vector<2x128xf32> to vector<2x32xf32>
    %368 = math.tanh %367 : vector<2x32xf32>
    %369 = vector.extract_strided_slice %366 {offsets = [0, 0], sizes = [2, 32], strides = [1, 1]} : vector<2x96xf32> to vector<2x32xf32>
    %370 = vector.extract_strided_slice %366 {offsets = [0, 32], sizes = [2, 32], strides = [1, 1]} : vector<2x96xf32> to vector<2x32xf32>
    %371 = vector.extract_strided_slice %366 {offsets = [0, 64], sizes = [2, 32], strides = [1, 1]} : vector<2x96xf32> to vector<2x32xf32>
    %372 = arith.mulf %370, %319 : vector<2x32xf32>
    %373 = arith.mulf %369, %368 : vector<2x32xf32>
    %374 = arith.addf %372, %373 : vector<2x32xf32>
    %375 = math.tanh %374 : vector<2x32xf32>
    %376 = arith.mulf %371, %375 : vector<2x32xf32>
    %377 = tpu.concatenate %376, %341 in 1 : vector<2x32xf32>, vector<2x32xf32> -> vector<2x64xf32>
    %cst_89 = arith.constant dense<0.000000e+00> : vector<2x128xf32>
    %378 = tpu.matmul %377, %13, %cst_89 {dimension_numbers = #tpu.dot_dimension_numbers<[1], [0], [0], [1], [0, 0, 1, 1], [], []>} : vector<2x64xf32>, vector<64x128xf32>, vector<2x128xf32> -> vector<2x128xf32>
    %379 = vector.broadcast %14 : vector<1x128xf32> to vector<2x128xf32>
    %380 = arith.addf %378, %379 : vector<2x128xf32>
    %381 = vector.extract_strided_slice %380 {offsets = [0, 0], sizes = [2, 96], strides = [1, 1]} : vector<2x128xf32> to vector<2x96xf32>
    %382 = arith.negf %381 : vector<2x96xf32>
    %383 = math.exp %382 : vector<2x96xf32>
    %cst_90 = arith.constant 1.000000e+00 : f32
    %384 = vector.broadcast %cst_90 : f32 to vector<2x96xf32>
    %385 = arith.addf %384, %383 : vector<2x96xf32>
    %386 = arith.divf %384, %385 : vector<2x96xf32>
    %387 = vector.extract_strided_slice %380 {offsets = [0, 96], sizes = [2, 32], strides = [1, 1]} : vector<2x128xf32> to vector<2x32xf32>
    %388 = math.tanh %387 : vector<2x32xf32>
    %389 = vector.extract_strided_slice %386 {offsets = [0, 0], sizes = [2, 32], strides = [1, 1]} : vector<2x96xf32> to vector<2x32xf32>
    %390 = vector.extract_strided_slice %386 {offsets = [0, 32], sizes = [2, 32], strides = [1, 1]} : vector<2x96xf32> to vector<2x32xf32>
    %391 = vector.extract_strided_slice %386 {offsets = [0, 64], sizes = [2, 32], strides = [1, 1]} : vector<2x96xf32> to vector<2x32xf32>
    %392 = arith.mulf %390, %339 : vector<2x32xf32>
    %393 = arith.mulf %389, %388 : vector<2x32xf32>
    %394 = arith.addf %392, %393 : vector<2x32xf32>
    %395 = math.tanh %394 : vector<2x32xf32>
    %396 = arith.mulf %391, %395 : vector<2x32xf32>
    %397 = arith.index_cast %c6_i32 : i32 to index
    %c0_91 = arith.constant 0 : index
    %c0_92 = arith.constant 0 : index
    %398 = vector.load %arg3[%397, %c0_91, %c0_92] : memref<8x2x32xbf16, #tpu.memory_space<vmem>>, vector<1x2x32xbf16>
    %399 = vector.shape_cast %398 : vector<1x2x32xbf16> to vector<2x32xbf16>
    %400 = arith.extf %399 : vector<2x32xbf16> to vector<2x32xf32>
    %401 = arith.mulf %396, %400 : vector<2x32xf32>
    %402 = vector.broadcast %15 : vector<1x32xf32> to vector<2x32xf32>
    %403 = arith.mulf %401, %402 : vector<2x32xf32>
    %cst_93 = arith.constant dense<0.000000e+00> : vector<2xf32>
    %404 = vector.multi_reduction <add>, %403, %cst_93 [1] : vector<2x32xf32> to vector<2xf32>
    %405 = vector.shape_cast %404 : vector<2xf32> to vector<2x1xf32>
    %406 = vector.broadcast %c6_i32 : i32 to vector<2x8xi32>
    %407 = arith.cmpi eq, %16, %406 : vector<2x8xi32>
    %408 = vector.shape_cast %405 : vector<2x1xf32> to vector<2x1xf32>
    %409 = vector.broadcast %408 : vector<2x1xf32> to vector<2x8xf32>
    %410 = arith.select %407, %409, %355 : vector<2x8xi1>, vector<2x8xf32>
    %c7_i32 = arith.constant 7 : i32
    %411 = arith.index_cast %c7_i32 : i32 to index
    %c0_94 = arith.constant 0 : index
    %c0_95 = arith.constant 0 : index
    %412 = vector.load %arg16[%411, %c0_94, %c0_95] : memref<8x2x128xf32, #tpu.memory_space<vmem>>, vector<1x2x128xf32>
    %413 = vector.shape_cast %412 : vector<1x2x128xf32> to vector<2x128xf32>
    %cst_96 = arith.constant dense<0.000000e+00> : vector<2x128xf32>
    %414 = tpu.matmul %376, %12, %cst_96 {dimension_numbers = #tpu.dot_dimension_numbers<[1], [0], [0], [1], [0, 0, 1, 1], [], []>} : vector<2x32xf32>, vector<32x128xf32>, vector<2x128xf32> -> vector<2x128xf32>
    %415 = arith.addf %413, %414 : vector<2x128xf32>
    %416 = vector.extract_strided_slice %415 {offsets = [0, 0], sizes = [2, 96], strides = [1, 1]} : vector<2x128xf32> to vector<2x96xf32>
    %417 = arith.negf %416 : vector<2x96xf32>
    %418 = math.exp %417 : vector<2x96xf32>
    %cst_97 = arith.constant 1.000000e+00 : f32
    %419 = vector.broadcast %cst_97 : f32 to vector<2x96xf32>
    %420 = arith.addf %419, %418 : vector<2x96xf32>
    %421 = arith.divf %419, %420 : vector<2x96xf32>
    %422 = vector.extract_strided_slice %415 {offsets = [0, 96], sizes = [2, 32], strides = [1, 1]} : vector<2x128xf32> to vector<2x32xf32>
    %423 = math.tanh %422 : vector<2x32xf32>
    %424 = vector.extract_strided_slice %421 {offsets = [0, 0], sizes = [2, 32], strides = [1, 1]} : vector<2x96xf32> to vector<2x32xf32>
    %425 = vector.extract_strided_slice %421 {offsets = [0, 32], sizes = [2, 32], strides = [1, 1]} : vector<2x96xf32> to vector<2x32xf32>
    %426 = vector.extract_strided_slice %421 {offsets = [0, 64], sizes = [2, 32], strides = [1, 1]} : vector<2x96xf32> to vector<2x32xf32>
    %427 = arith.mulf %425, %374 : vector<2x32xf32>
    %428 = arith.mulf %424, %423 : vector<2x32xf32>
    %429 = arith.addf %427, %428 : vector<2x32xf32>
    %430 = math.tanh %429 : vector<2x32xf32>
    %431 = arith.mulf %426, %430 : vector<2x32xf32>
    %432 = tpu.concatenate %431, %396 in 1 : vector<2x32xf32>, vector<2x32xf32> -> vector<2x64xf32>
    %cst_98 = arith.constant dense<0.000000e+00> : vector<2x128xf32>
    %433 = tpu.matmul %432, %13, %cst_98 {dimension_numbers = #tpu.dot_dimension_numbers<[1], [0], [0], [1], [0, 0, 1, 1], [], []>} : vector<2x64xf32>, vector<64x128xf32>, vector<2x128xf32> -> vector<2x128xf32>
    %434 = vector.broadcast %14 : vector<1x128xf32> to vector<2x128xf32>
    %435 = arith.addf %433, %434 : vector<2x128xf32>
    %436 = vector.extract_strided_slice %435 {offsets = [0, 0], sizes = [2, 96], strides = [1, 1]} : vector<2x128xf32> to vector<2x96xf32>
    %437 = arith.negf %436 : vector<2x96xf32>
    %438 = math.exp %437 : vector<2x96xf32>
    %cst_99 = arith.constant 1.000000e+00 : f32
    %439 = vector.broadcast %cst_99 : f32 to vector<2x96xf32>
    %440 = arith.addf %439, %438 : vector<2x96xf32>
    %441 = arith.divf %439, %440 : vector<2x96xf32>
    %442 = vector.extract_strided_slice %435 {offsets = [0, 96], sizes = [2, 32], strides = [1, 1]} : vector<2x128xf32> to vector<2x32xf32>
    %443 = math.tanh %442 : vector<2x32xf32>
    %444 = vector.extract_strided_slice %441 {offsets = [0, 0], sizes = [2, 32], strides = [1, 1]} : vector<2x96xf32> to vector<2x32xf32>
    %445 = vector.extract_strided_slice %441 {offsets = [0, 32], sizes = [2, 32], strides = [1, 1]} : vector<2x96xf32> to vector<2x32xf32>
    %446 = vector.extract_strided_slice %441 {offsets = [0, 64], sizes = [2, 32], strides = [1, 1]} : vector<2x96xf32> to vector<2x32xf32>
    %447 = arith.mulf %445, %394 : vector<2x32xf32>
    %448 = arith.mulf %444, %443 : vector<2x32xf32>
    %449 = arith.addf %447, %448 : vector<2x32xf32>
    %450 = math.tanh %449 : vector<2x32xf32>
    %451 = arith.mulf %446, %450 : vector<2x32xf32>
    %452 = arith.index_cast %c7_i32 : i32 to index
    %c0_100 = arith.constant 0 : index
    %c0_101 = arith.constant 0 : index
    %453 = vector.load %arg3[%452, %c0_100, %c0_101] : memref<8x2x32xbf16, #tpu.memory_space<vmem>>, vector<1x2x32xbf16>
    %454 = vector.shape_cast %453 : vector<1x2x32xbf16> to vector<2x32xbf16>
    %455 = arith.extf %454 : vector<2x32xbf16> to vector<2x32xf32>
    %456 = arith.mulf %451, %455 : vector<2x32xf32>
    %457 = vector.broadcast %15 : vector<1x32xf32> to vector<2x32xf32>
    %458 = arith.mulf %456, %457 : vector<2x32xf32>
    %cst_102 = arith.constant dense<0.000000e+00> : vector<2xf32>
    %459 = vector.multi_reduction <add>, %458, %cst_102 [1] : vector<2x32xf32> to vector<2xf32>
    %460 = vector.shape_cast %459 : vector<2xf32> to vector<2x1xf32>
    %461 = vector.broadcast %c7_i32 : i32 to vector<2x8xi32>
    %462 = arith.cmpi eq, %16, %461 : vector<2x8xi32>
    %463 = vector.shape_cast %460 : vector<2x1xf32> to vector<2x1xf32>
    %464 = vector.broadcast %463 : vector<2x1xf32> to vector<2x8xf32>
    %465 = arith.select %462, %464, %410 : vector<2x8xi1>, vector<2x8xf32>
    %c8_i32 = arith.constant 8 : i32
    %c0_103 = arith.constant 0 : index
    %c0_104 = arith.constant 0 : index
    %c0_105 = arith.constant 0 : index
    %466 = vector.load %arg14[%c0_103, %c0_104, %c0_105] : memref<2x2x32xf32, #tpu.memory_space<vmem>>, vector<1x2x32xf32>
    %467 = vector.shape_cast %466 : vector<1x2x32xf32> to vector<2x32xf32>
    %468 = vector.shape_cast %431 : vector<2x32xf32> to vector<1x2x32xf32>
    tpu.vector_store %arg14[%c0_103, %c0_104, %c0_105], %468 {strides = array<i32>} : memref<2x2x32xf32, #tpu.memory_space<vmem>>, vector<1x2x32xf32>,
    %c0_106 = arith.constant 0 : index
    %c0_107 = arith.constant 0 : index
    %c0_108 = arith.constant 0 : index
    %469 = vector.load %arg15[%c0_106, %c0_107, %c0_108] : memref<2x2x32xf32, #tpu.memory_space<vmem>>, vector<1x2x32xf32>
    %470 = vector.shape_cast %469 : vector<1x2x32xf32> to vector<2x32xf32>
    %471 = vector.shape_cast %429 : vector<2x32xf32> to vector<1x2x32xf32>
    tpu.vector_store %arg15[%c0_106, %c0_107, %c0_108], %471 {strides = array<i32>} : memref<2x2x32xf32, #tpu.memory_space<vmem>>, vector<1x2x32xf32>,
    %c1_109 = arith.constant 1 : index
    %c0_110 = arith.constant 0 : index
    %c0_111 = arith.constant 0 : index
    %472 = vector.load %arg14[%c1_109, %c0_110, %c0_111] : memref<2x2x32xf32, #tpu.memory_space<vmem>>, vector<1x2x32xf32>
    %473 = vector.shape_cast %472 : vector<1x2x32xf32> to vector<2x32xf32>
    %474 = vector.shape_cast %451 : vector<2x32xf32> to vector<1x2x32xf32>
    tpu.vector_store %arg14[%c1_109, %c0_110, %c0_111], %474 {strides = array<i32>} : memref<2x2x32xf32, #tpu.memory_space<vmem>>, vector<1x2x32xf32>,
    %c1_112 = arith.constant 1 : index
    %c0_113 = arith.constant 0 : index
    %c0_114 = arith.constant 0 : index
    %475 = vector.load %arg15[%c1_112, %c0_113, %c0_114] : memref<2x2x32xf32, #tpu.memory_space<vmem>>, vector<1x2x32xf32>
    %476 = vector.shape_cast %475 : vector<1x2x32xf32> to vector<2x32xf32>
    %477 = vector.shape_cast %449 : vector<2x32xf32> to vector<1x2x32xf32>
    tpu.vector_store %arg15[%c1_112, %c0_113, %c0_114], %477 {strides = array<i32>} : memref<2x2x32xf32, #tpu.memory_space<vmem>>, vector<1x2x32xf32>,
    %c0_115 = arith.constant 0 : index
    %c0_116 = arith.constant 0 : index
    %478 = vector.load %arg12[%c0_115, %c0_116] : memref<1x1xf32, #tpu.memory_space<vmem>>, vector<1x1xf32>
    %479 = vector.broadcast %478 : vector<1x1xf32> to vector<2x8xf32>
    %480 = arith.addf %465, %479 : vector<2x8xf32>
    %c0_117 = arith.constant 0 : index
    %c0_118 = arith.constant 0 : index
    %481 = vector.load %arg13[%c0_117, %c0_118] : memref<2x8xf32, #tpu.memory_space<vmem>>, vector<2x8xf32>
    tpu.vector_store %arg13[%c0_117, %c0_118], %480 {strides = array<i32>} : memref<2x8xf32, #tpu.memory_space<vmem>>, vector<2x8xf32>,
    return
  }
  func.func @transform_0(%arg0: i32, %arg1: i32) -> (i32, i32, i32) {
    %c0_i32 = arith.constant 0 : i32
    %c0_i32_0 = arith.constant 0 : i32
    return %arg1, %arg0, %c0_i32 : i32, i32, i32
  }
  func.func @transform_1(%arg0: i32, %arg1: i32) -> (i32, i32, i32) {
    %c0_i32 = arith.constant 0 : i32
    %c0_i32_0 = arith.constant 0 : i32
    return %arg1, %arg0, %c0_i32 : i32, i32, i32
  }
  func.func @transform_2(%arg0: i32, %arg1: i32) -> (i32, i32) {
    %c0_i32 = arith.constant 0 : i32
    %c0_i32_0 = arith.constant 0 : i32
    %c0_i32_1 = arith.constant 0 : i32
    return %c0_i32, %c0_i32_0 : i32, i32
  }
  func.func @transform_3(%arg0: i32, %arg1: i32) -> (i32, i32) {
    %c0_i32 = arith.constant 0 : i32
    %c0_i32_0 = arith.constant 0 : i32
    %c0_i32_1 = arith.constant 0 : i32
    return %c0_i32, %c0_i32_0 : i32, i32
  }
  func.func @transform_4(%arg0: i32, %arg1: i32) -> (i32, i32) {
    %c0_i32 = arith.constant 0 : i32
    %c0_i32_0 = arith.constant 0 : i32
    %c0_i32_1 = arith.constant 0 : i32
    return %c0_i32, %c0_i32_0 : i32, i32
  }
  func.func @transform_5(%arg0: i32, %arg1: i32) -> (i32, i32) {
    %c0_i32 = arith.constant 0 : i32
    %c0_i32_0 = arith.constant 0 : i32
    %c0_i32_1 = arith.constant 0 : i32
    return %c0_i32, %c0_i32_0 : i32, i32
  }
  func.func @transform_6(%arg0: i32, %arg1: i32) -> (i32, i32) {
    %c0_i32 = arith.constant 0 : i32
    %c0_i32_0 = arith.constant 0 : i32
    %c0_i32_1 = arith.constant 0 : i32
    return %c0_i32, %c0_i32_0 : i32, i32
  }
  func.func @transform_7(%arg0: i32, %arg1: i32) -> (i32, i32, i32) {
    %c0_i32 = arith.constant 0 : i32
    %c0_i32_0 = arith.constant 0 : i32
    %c0_i32_1 = arith.constant 0 : i32
    return %c0_i32, %arg0, %c0_i32_0 : i32, i32, i32
  }
  func.func @transform_8(%arg0: i32, %arg1: i32) -> (i32, i32, i32) {
    %c0_i32 = arith.constant 0 : i32
    %c0_i32_0 = arith.constant 0 : i32
    %c0_i32_1 = arith.constant 0 : i32
    return %c0_i32, %arg0, %c0_i32_0 : i32, i32, i32
  }
  func.func @transform_9(%arg0: i32, %arg1: i32) -> (i32, i32) {
    %c0_i32 = arith.constant 0 : i32
    %c0_i32_0 = arith.constant 0 : i32
    %c0_i32_1 = arith.constant 0 : i32
    return %c0_i32, %c0_i32_0 : i32, i32
  }
  func.func @transform_10(%arg0: i32, %arg1: i32) -> (i32, i32) {
    %c0_i32 = arith.constant 0 : i32
    %c0_i32_0 = arith.constant 0 : i32
    %c0_i32_1 = arith.constant 0 : i32
    return %c0_i32, %c0_i32_0 : i32, i32
  }
  func.func @transform_11(%arg0: i32, %arg1: i32) -> (i32, i32) {
    %c0_i32 = arith.constant 0 : i32
    return %arg0, %arg1 : i32, i32
  }
}

</mosaic_0001>

<bundles_post_ra>
// kernel: tpu_custom_call.1
= control target key start
LH: loop header
LB: loop body
LE: loop exit
PB: predicated region body
PF: predicated region fallthrough
CT: control target
= control target key end

     0   :  { %s3565_s0 = inlined_call_operand.vmem [shape: f32[8,2,4], index: 0, kind: input, shape index: {}]   ;;  %s3566_s1 = inlined_call_operand.hbm [shape: bf16[8,2,32], index: 1, kind: input, shape index: {}]   ;;  %s3567_s2 = inlined_call_operand.vmem [shape: f32[4,128], index: 2, kind: input, shape index: {}]   ;;  %s3568_s3 = inlined_call_operand.vmem [shape: f32[32,128], index: 3, kind: input, shape index: {}]   ;;  %s3569_s4 = inlined_call_operand.vmem [shape: f32[1,128], index: 4, kind: input, shape index: {}]   ;;  %s3570_s5 = inlined_call_operand.hbm [shape: f32[64,128], index: 5, kind: input, shape index: {}]   ;;  %s3571_s6 = inlined_call_operand.vmem [shape: f32[1,128], index: 6, kind: input, shape index: {}]   ;;  %s3572_s7 = inlined_call_operand.vmem [shape: f32[2,2,32], index: 7, kind: input, shape index: {}]   ;;  %s3573_s8 = inlined_call_operand.vmem [shape: f32[2,2,32], index: 8, kind: input, shape index: {}]   ;;  %s3574_s9 = inlined_call_operand.vmem [shape: f32[1,32], index: 9, kind: input, shape index: {}]   ;;  %s3575_s10 = inlined_call_operand.<no memory space> [shape: f32[1,1], index: 10, kind: input, shape index: {}]   ;;  %s3576_s11 = inlined_call_operand.hbm [shape: f32[2,8], index: 11, kind: output, shape index: {}]  }
   0x1   :  { %v16_v0 = vstv %s3575_s10 }
   0x2   :  { %17 = vst [vmem:[#allocation5] sm:$0x1] %v16_v0 }
   0x3   :  { %18 = vsyncpa [#allocation7], 0 }
   0x4   :  { %19 = vsyncpa [#allocation10], 0 }
   0x5   :  { %20 = vsyncpa [#allocation8], 0  ;;  %s2990_s19 = smov [#allocation6]   ;;  %s2918_s23 = scalar_lea.hbm %s3566_s1, 128 }
   0x6   :  { %s28_s20 = sshll.u32 %s2990_s19, 4  ;;  %p2919_p0 = scmp.ne.s32.totalorder %s3566_s1, %s2918_s23  ;;  %s29_s20 = int_to_ptr.vmem [resolvable:$true] %s28_s20 }
   0x7   :  { %p2922_p1 = scmp.lt.u32.totalorder %s2918_s23, %s3566_s1 }
   0x9   :  { %p2924_p2 = pnand %p2922_p1, %p2919_p0 }
   0xb   :  { %2927 = shalt.err (!%p2924_p2)
}
   0xc   :  { %s2928_s10 = scalar_lea.vmem %s29_s20, 128  ;;  %p2933_p4 = scmp.lt.s32.totalorder %s29_s20, %s29_s20 }
   0xd   :  { %p2929_p3 = scmp.ne.s32.totalorder %s29_s20, %s2928_s10  ;;  %p2934_p5 = scmp.lt.s32.totalorder %s2928_s10, %s2928_s10 }
   0xf   :  { %p2935_p6 = por %p2934_p5, %p2933_p4 }
  0x11   :  { %p2936_p7 = pnand %p2935_p6, %p2929_p3 }
  0x13   :  { %2939 = shalt.err (!%p2936_p7)
}
  0x14   :  { %s2991_s28 = smov 16   ;;  %s2992_s29 = smov 1  }
  0x15   :  { %34 = dma.hbm_to_vmem [thread:$0]  %s3566_s1, 128, %s29_s20, [#allocation7], %s2991_s28, %s2991_s28, %s2992_s29  }
  0x16   :  { %s2993_s13 = smov [#allocation9]   ;;  %s2940_s17 = scalar_lea.hbm %s3570_s5, 1024 }
  0x17   :  { %s46_s14 = sshll.u32 %s2993_s13, 4  ;;  %p2941_p8 = scmp.ne.s32.totalorder %s3570_s5, %s2940_s17  ;;  %s47_s14 = int_to_ptr.vmem [resolvable:$true] %s46_s14 }
  0x18   :  { %p2944_p9 = scmp.lt.u32.totalorder %s2940_s17, %s3570_s5 }
  0x1a   :  { %p2946_p10 = pnand %p2944_p9, %p2941_p8 }
  0x1c   :  { %2949 = shalt.err (!%p2946_p10)
}
  0x1d   :  { %s2950_s23 = scalar_lea.vmem %s47_s14, 1024  ;;  %p2955_p12 = scmp.lt.s32.totalorder %s47_s14, %s47_s14 }
  0x1e   :  { %p2951_p11 = scmp.ne.s32.totalorder %s47_s14, %s2950_s23  ;;  %p2956_p13 = scmp.lt.s32.totalorder %s2950_s23, %s2950_s23 }
  0x20   :  { %p2957_p0 = por %p2956_p13, %p2955_p12 }
  0x22   :  { %p2958_p1 = pnand %p2957_p0, %p2951_p11 }
  0x24   :  { %2961 = shalt.err (!%p2958_p1)
}
  0x25   :  { %s2994_s1 = smov 128   ;;  %s2995_s20 = smov 8  }
  0x26   :  { %52 = dma.hbm_to_vmem [thread:$0]  %s3570_s5, 1024, %s47_s14, [#allocation10], %s2994_s1, %s2994_s1, %s2995_s20  }
  0x27   :  { %2984 = dma.done.wait [#allocation7], 128  }
  0x28   :  { %2985 = vsyncadd [#allocation7], 4294967168 }
  0x29   :  { %2986 = dma.done.wait [#allocation10], 1024  }
  0x2a   :  { %2987 = vsyncadd [#allocation10], 4294966272  ;;  %v111_v1 = vlaneseq  ;;  %v2996_v2 = vmov 1983009808   ;;  %v2997_v5 = vmov 0.0|0.0   ;;  %vm2998_vm0 = vmmov 0  }
  0x2b   :  { %v109_v3 = vunpack.c.l.s4 %v2996_v2  ;;  %2628 = vmatprep.subr.bf16.mxu1 %v2997_v5  ;;  %v2999_v6 = vmov 0.0   ;;  %vm145_vm1 = vcmask 1043456   ;;  %vm75_vm2 = vcmask 254976   ;;  %v90_v9 = vld [vmem:[%s3567_s2] sm:$0xf]  ;;  %v277_v24 = vld [vmem:[%s3568_s3 + $0x8] sm:$0xff] }
  0x2c   :  { %v112_v4 = vshrl.u32 %v111_v1, 7  ;;  %2408 = vmatprep.mubr.msk.f32.mxu1 %vm2998_vm0, %v2999_v6  ;;  %v82_v10 = vld [vmem:[%s3565_s0] sm:$0x3]  ;;  %v83_v11 = vld [vmem:[%s3565_s0 + $0x2] sm:$0x3]  ;;  %2365 = vmatprep.subr.msk.mxu0 %vm145_vm1, %v90_v9  ;;  %vm140_vm3 = vcmask 31744  }
  0x2d   :  { %v110_v7 = vunpack.c.0.s8 %v109_v3  ;;  %v84_v12 = vld [vmem:[%s3565_s0 + $0x4] sm:$0x3]  ;;  %v85_v13 = vld [vmem:[%s3565_s0 + $0x6] sm:$0x3]  ;;  %v106_v14 = vcombine.low %v82_v10, %v83_v11  ;;  %v86_v15 = vld [vmem:[%s3565_s0 + $0x8] sm:$0x3]  ;;  %2366 = vmatpush3.msk.msra.mxu0 %vm145_vm1, %v90_v9 }
  0x2e   :  { %v107_v16 = vcombine.low %v84_v12, %v85_v13  ;;  %v87_v17 = vld [vmem:[%s3565_s0 + $0xa] sm:$0x3]  ;;  %v88_v18 = vld [vmem:[%s3565_s0 + $0xc] sm:$0x3]  ;;  %v89_v19 = vld [vmem:[%s3565_s0 + $0xe] sm:$0x3]  ;;  %2610 = vmatprep.subr.bf16.mxu0 %v2997_v5 }
  0x2f   :  { %v3096_v8 = vsub.s32 %v110_v7, %v112_v4  ;;  %v123_v21 = vcombine.low %v86_v15, %v87_v17  ;;  %v124_v22 = vcombine.low %v88_v18, %v89_v19  ;;  %v276_v23 = vld [vmem:[%s3568_s3] sm:$0xff]  ;;  %v278_v31 = vld [vmem:[%s3568_s3 + $0x10] sm:$0xff]  ;;  %v279_v32 = vld [vmem:[%s3568_s3 + $0x18] sm:$0xff]  ;;  %vm299_vm4 = vcmask 261120  }
  0x30   :  { %v3134_v26 = vpack.c.bf16 %v277_v24, %v276_v23  ;;  %v73_v27 = vld [vmem:[%s3572_s7] sm:$0x3]  ;;  %v3150_v34 = vpack.c.bf16 %v279_v32, %v278_v31  ;;  %v74_v0 = vld [vmem:[%s3572_s7 + $0x2] sm:$0x3]  ;;  %v281_v10 = vld [vmem:[#allocation9 + $0x8] sm:$0xff]  ;;  %s3001_s7 = smov 64  }
  0x31   :  { %v114_v20 = vrot.slane %v106_v14, %v3096_v8  ;;  %v121_v25 = vrot.slane %v107_v16, %v3096_v8  ;;  %v131_v28 = vrot.slane %v123_v21, %v3096_v8  ;;  %v138_v29 = vrot.slane %v124_v22, %v3096_v8  ;;  %76 = vst.msk [vmem:[#allocation2] sm:$0x3] %vm75_vm2, %v73_v27  ;;  %v78_v36 = vld [vmem:[%s3573_s8] sm:$0x3]  ;;  %v282_v11 = vld [vmem:[#allocation9 + $0x10] sm:$0xff]  ;;  %v285_v16 = vld [vmem:[#allocation9 + $0x28] sm:$0xff] }
  0x32   :  { %2630 = vmatpush3.bf16.msra.mxu1 %v3134_v26  ;;  %80 = vst.msk [vmem:[#allocation3] sm:$0x3] %vm75_vm2, %v78_v36  ;;  %v2207_v37 = vld [vmem:[%s3569_s4] ss:$0 sm:$0xff]  ;;  %s3000_s4 = smov 32   ;;  %v280_v9 = vld [vmem:[#allocation9] sm:$0xff] }
  0x33   :  { %v122_v30 = vcombine.low %v114_v20, %v121_v25  ;;  %v139_v33 = vcombine.low %v131_v28, %v138_v29  ;;  %2631 = vmatprep.subr.bf16.mxu1 %v2997_v5  ;;  %77 = vst.msk [vmem:[#allocation2 + $0x2] sm:$0x3] %vm75_vm2, %v74_v0  ;;  %v3184_v12 = vpack.c.bf16 %v281_v10, %v280_v9  ;;  %v283_v13 = vld [vmem:[#allocation9 + $0x18] sm:$0xff]  ;;  %v284_v15 = vld [vmem:[#allocation9 + $0x20] sm:$0xff]  ;;  %v286_v18 = vld [vmem:[#allocation9 + $0x30] sm:$0xff]  ;;  %vm417_vm5 = vcmask 523264  }
  0x34   :  { %v3187_v14 = vpack.c.bf16 %v283_v13, %v282_v11  ;;  %v3191_v17 = vpack.c.bf16 %v285_v16, %v284_v15  ;;  %v287_v19 = vld [vmem:[#allocation9 + $0x38] sm:$0xff]  ;;  %v79_v29 = vld [vmem:[%s3573_s8 + $0x2] sm:$0x3]  ;;  %vm2189_vm14 = vcmask 58368  }
  0x35   :  { %2367 = vmatprep.mubr.msk.f32.mxu0 %vm140_vm3, %v122_v30  ;;  %v3196_v21 = vpack.c.bf16 %v287_v19, %v286_v18  ;;  %81 = vst.msk [vmem:[#allocation3 + $0x2] sm:$0x3] %vm75_vm2, %v79_v29  ;;  %v3229_v30 = vld [vmem:[%s3571_s6] ss:$0 sm:$0xff]  ;;  %s3002_s6 = smov 96  }
  0x36   :  { %2368 = vmatmul.mubr.msk.f32.vlgmr.msra.gmra.mrb[0].mxu0 %vm140_vm3, %v139_v33  ;;  %2633 = vmatpush3.bf16.msra.mxu1 %v3150_v34 }
  0x37   :  { %2612 = vmatpush3.bf16.msra.mxu0 %v3134_v26  ;;  %2378 = vmatprep.mubr.msk.f32.mxu0 %vm2998_vm0, %v2999_v6 }
  0x38   :  { %2613 = vmatprep.subr.bf16.mxu0 %v2997_v5  ;;  %2634 = vmatprep.subr.bf16.mxu1 %v2997_v5  ;;  %v292_v35 = vld [vmem:[#allocation2] sm:$0x3] }
  0x39   :  { %v295_v57 = vld [vmem:[#allocation3] sm:$0x3] }
  0x3a   :  { %v294_v22 = vld [vmem:[#allocation2 + $0x2] sm:$0x3] }
  0x3b   :  { %2615 = vmatpush3.bf16.msra.mxu0 %v3150_v34 }
  0x3c   :  { %2616 = vmatprep.subr.bf16.mxu0 %v2997_v5 }
  0x3e   :  { %2379 = vmatmul.mubr.msk.f32.vlgmr.msra.gmra.mrb[2].mxu0 %vm299_vm4, %v292_v35 }
  0x3f   :  { %2397 = vmatprep.mubr.msk.f32.mxu0 %vm2998_vm0, %v2999_v6  ;;  %2618 = vmatpush3.bf16.msra.mxu0 %v3184_v12 }
  0x40   :  { %2619 = vmatprep.subr.bf16.mxu0 %v2997_v5 }
  0x43   :  { %2621 = vmatpush3.bf16.msra.mxu0 %v3187_v14 }
  0x44   :  { %2622 = vmatprep.subr.bf16.mxu0 %v2997_v5 }
  0x47   :  { %2624 = vmatpush3.bf16.msra.mxu0 %v3191_v17 }
  0x48   :  { %2625 = vmatprep.subr.bf16.mxu0 %v2997_v5 }
  0x4b   :  { %2627 = vmatpush3.bf16.msra.mxu0 %v3196_v21 }
  0x4c   :  { %2646 = vmatprep.subr.bf16.mxu0 %v2997_v5 }
 0x109   :  { %v2369_v38 = vpop.f32.mrb[0].mxu0 }
 0x10a   :  { %v221_v39 = vadd.f32 %v2369_v38, %v2207_v37  ;;  %v215_v40 = vpop.f32.mrb[1].mxu0 }
 0x10b   :  { %v216_v41 = vadd.f32 %v2207_v37, %v215_v40 }
 0x10c   :  { %v243_v42 = vcombine.high %v221_v39, %v221_v39  ;;  %v250_v43 = vrot.slane %v221_v39, %v3096_v8  ;;  %2213 = vst.sshfl [vmem:[#allocation4 + $0x8] sm:$0x3 pattern:$0x76325410] %v221_v39 }
 0x10d   :  { %v226_v44 = vcombine.high %v216_v41, %v216_v41  ;;  %v233_v45 = vrot.slane %v216_v41, %v3096_v8  ;;  %2211 = vst.sshfl [vmem:[#allocation4] sm:$0x3 pattern:$0x76325410] %v216_v41  ;;  %v297_v41 = vld [vmem:[#allocation3 + $0x2] sm:$0x3] }
 0x10e   :  { %v257_v46 = vrot.slane %v243_v42, %v3096_v8  ;;  %v258_v47 = vcombine.high %v250_v43, %v250_v43  ;;  %2214 = vst.sshfl [vmem:[#allocation4 + $0xc] sm:$0x3 pattern:$0x76325410] %v243_v42 }
 0x10f   :  { %v240_v48 = vrot.slane %v226_v44, %v3096_v8  ;;  %v241_v49 = vcombine.high %v233_v45, %v233_v45  ;;  %2212 = vst.sshfl [vmem:[#allocation4 + $0x4] sm:$0x3 pattern:$0x76325410] %v226_v44 }
 0x110   :  { %v259_v50 = vcombine.high %v257_v46, %v257_v46  ;;  %273 = vst [vmem:[#allocation4 + $0xa] sm:$0x3] %v258_v47 }
 0x111   :  { %v242_v51 = vcombine.high %v240_v48, %v240_v48  ;;  %269 = vst [vmem:[#allocation4 + $0x2] sm:$0x3] %v241_v49  ;;  %v369_v52 = vpop.f32.mrb[2].mxu0 }
 0x112   :  { %275 = vst [vmem:[#allocation4 + $0xe] sm:$0x3] %v259_v50  ;;  %v2380_v53 = vpop.f32.mrb[3].mxu0 }
 0x113   :  { %271 = vst [vmem:[#allocation4 + $0x6] sm:$0x3] %v242_v51 }
 0x114   :  { %v298_v54 = vld [vmem:[#allocation4] sm:$0x3] }
 0x115   :  { %v373_v55 = vadd.f32 %v369_v52, %v298_v54 }
 0x116   :  { %v783_v10 = vld [vmem:[#allocation4 + $0x4] sm:$0x3] }
 0x117   :  { %2790 = vtanh.f32 %v373_v55  ;;  %v2216_v58 = vmul.f32 -1.442695, %v373_v55 }
 0x118   :  { %v553_v31 = vld [vmem:[#allocation4 + $0x2] sm:$0x3] }
 0x119   :  { %2792 = vpow2.f32 %v2216_v58 }
 0x121   :  { %v2791_v56 = vpop.eup %2790 }
 0x122   :  { %387 = vrot.lane.b32.xlu0 %v2791_v56, %s3000_s4 }
 0x123   :  { %v2793_v59 = vpop.eup %2792 }
 0x124   :  { %v377_v60 = vadd.f32 1.0, %v2793_v59 }
 0x126   :  { %382 = vrot.lane.b32.xlu0 %v295_v57, %s3000_s4  ;;  %2794 = vrcp.f32 %v377_v60 }
 0x130   :  { %v2795_v61 = vpop.eup %2794 }
 0x194   :  { %v388_v62 = vpop.permute.xlu0 %387 }
 0x195   :  { %v390_v63 = vmul.f32 %v2795_v61, %v388_v62 }
 0x197   :  { %392 = vrot.lane.b32.xlu1 %v390_v63, %s3000_s4 }
 0x198   :  { %v383_v2 = vpop.permute.xlu0 %382 }
 0x199   :  { %v385_v3 = vmul.f32 %v2795_v61, %v383_v2 }
 0x209   :  { %v393_v4 = vpop.permute.xlu1 %392 }
 0x20a   :  { %v3181_v7 = vadd.f32 %v393_v4, %v385_v3 }
 0x20c   :  { %2796 = vtanh.f32 %v3181_v7 }
 0x216   :  { %v2797_v20 = vpop.eup %2796 }
 0x217   :  { %398 = vrot.lane.b32.xlu1 %v2797_v20, %s3000_s4 }
 0x21b   :  { %407 = vrot.lane.b32.xlu1 %v294_v22, %s3000_s4 }
 0x289   :  { %v399_v23 = vpop.permute.xlu1 %398 }
 0x28a   :  { %v401_v24 = vmul.f32 %v2795_v61, %v399_v23 }
 0x28c   :  { %403 = vrot.lane.b32.xlu0 %v401_v24, %s3001_s7 }
 0x28d   :  { %v408_v25 = vpop.permute.xlu1 %407 }
 0x2fe   :  { %v404_v27 = vpop.permute.xlu0 %403 }
 0x2ff   :  { %v410_v28 = vsel %vm299_vm4, %v404_v27, %v408_v25  ;;  %2409 = vmatmul.mubr.msk.f32.vlgmr.msra.gmra.mrb[0].mxu1 %vm299_vm4, %v404_v27 }
 0x300   :  { %2398 = vmatmul.mubr.msk.f32.vlgmr.msra.gmra.mrb[4].mxu0 %vm417_vm5, %v410_v28  ;;  %2636 = vmatpush3.bf16.msra.mxu1 %v3184_v12 }
 0x301   :  { %2637 = vmatprep.subr.bf16.mxu1 %v2997_v5  ;;  %2648 = vmatpush3.bf16.msra.mxu0 %v3134_v26 }
 0x302   :  { %2649 = vmatprep.subr.bf16.mxu0 %v2997_v5  ;;  %2438 = vmatprep.mubr.msk.f32.mxu0 %vm2998_vm0, %v2999_v6 }
 0x303   :  { %2427 = vmatprep.mubr.msk.f32.mxu1 %vm2998_vm0, %v2999_v6 }
 0x304   :  { %2639 = vmatpush3.bf16.msra.mxu1 %v3187_v14 }
 0x305   :  { %2640 = vmatprep.subr.bf16.mxu1 %v2997_v5  ;;  %2651 = vmatpush3.bf16.msra.mxu0 %v3150_v34 }
 0x306   :  { %2652 = vmatprep.subr.bf16.mxu0 %v2997_v5 }
 0x308   :  { %2642 = vmatpush3.bf16.msra.mxu1 %v3191_v17 }
 0x309   :  { %2643 = vmatprep.subr.bf16.mxu1 %v2997_v5 }
 0x30c   :  { %2645 = vmatpush3.bf16.msra.mxu1 %v3196_v21 }
 0x30d   :  { %2664 = vmatprep.subr.bf16.mxu1 %v2997_v5 }
 0x3d2   :  { %v622_v32 = vpop.f32.mrb[0].mxu1 }
 0x3d3   :  { %v626_v33 = vadd.f32 %v622_v32, %v553_v31  ;;  %v487_v35 = vpop.f32.mrb[4].mxu0  ;;  %v2410_v36 = vpop.f32.mrb[1].mxu1 }
 0x3d4   :  { %v488_v37 = vadd.f32 %v3229_v30, %v487_v35  ;;  %v2399_v38 = vpop.f32.mrb[5].mxu0 }
 0x3d5   :  { %2798 = vtanh.f32 %v626_v33  ;;  %v2222_v42 = vmul.f32 -1.442695, %v626_v33 }
 0x3d6   :  { %2800 = vtanh.f32 %v488_v37  ;;  %v2219_v43 = vmul.f32 -1.442695, %v488_v37 }
 0x3d7   :  { %2802 = vpow2.f32 %v2222_v42 }
 0x3d8   :  { %2804 = vpow2.f32 %v2219_v43 }
 0x3df   :  { %v2799_v39 = vpop.eup %2798 }
 0x3e0   :  { %v2801_v40 = vpop.eup %2800  ;;  %636 = vrot.lane.b32.xlu1 %v2799_v39, %s3000_s4 }
 0x3e1   :  { %504 = vrot.lane.b32.xlu0 %v2801_v40, %s3000_s4  ;;  %v2803_v44 = vpop.eup %2802 }
 0x3e2   :  { %v2805_v45 = vpop.eup %2804  ;;  %v630_v46 = vadd.f32 1.0, %v2803_v44 }
 0x3e3   :  { %v494_v47 = vadd.f32 1.0, %v2805_v45 }
 0x3e4   :  { %2806 = vrcp.f32 %v630_v46 }
 0x3e5   :  { %499 = vrot.lane.b32.xlu0 %v297_v41, %s3000_s4  ;;  %2808 = vrcp.f32 %v494_v47 }
 0x3ee   :  { %v2807_v48 = vpop.eup %2806 }
 0x3ef   :  { %v2809_v50 = vpop.eup %2808  ;;  %v634_v55 = vmul.f32 %v2807_v48, %v3181_v7 }
 0x452   :  { %v637_v49 = vpop.permute.xlu1 %636 }
 0x453   :  { %v639_v51 = vmul.f32 %v2807_v48, %v637_v49  ;;  %v505_v52 = vpop.permute.xlu0 %504 }
 0x454   :  { %v507_v53 = vmul.f32 %v2809_v50, %v505_v52 }
 0x455   :  { %641 = vrot.lane.b32.xlu0 %v639_v51, %s3000_s4 }
 0x456   :  { %509 = vrot.lane.b32.xlu1 %v507_v53, %s3000_s4  ;;  %v1013_v53 = vld [vmem:[#allocation4 + $0x6] sm:$0x3] }
 0x457   :  { %v500_v54 = vpop.permute.xlu0 %499 }
 0x458   :  { %v502_v56 = vmul.f32 %v2809_v50, %v500_v54 }
 0x4c7   :  { %v642_v57 = vpop.permute.xlu0 %641 }
 0x4c8   :  { %v3238_v58 = vadd.f32 %v642_v57, %v634_v55  ;;  %v510_v59 = vpop.permute.xlu1 %509 }
 0x4c9   :  { %v3240_v60 = vadd.f32 %v510_v59, %v502_v56 }
 0x4ca   :  { %2810 = vtanh.f32 %v3238_v58 }
 0x4cb   :  { %2812 = vtanh.f32 %v3240_v60 }
 0x4d4   :  { %v2811_v61 = vpop.eup %2810 }
 0x4d5   :  { %v2813_v62 = vpop.eup %2812  ;;  %647 = vrot.lane.b32.xlu0 %v2811_v61, %s3000_s4 }
 0x4d6   :  { %515 = vrot.lane.b32.xlu1 %v2813_v62, %s3000_s4 }
 0x547   :  { %v648_v63 = vpop.permute.xlu0 %647 }
 0x548   :  { %v650_v0 = vmul.f32 %v2807_v48, %v648_v63  ;;  %v516_v2 = vpop.permute.xlu1 %515 }
 0x549   :  { %v3246_v3 = vmul.f32 %v2809_v50, %v516_v2 }
 0x54a   :  { %652 = vrot.lane.b32.xlu1 %v650_v0, %s3001_s7 }
 0x54b   :  { %656 = vrot.lane.b32.xlu0 %v3246_v3, %s3002_s6 }
 0x5bc   :  { %v653_v4 = vpop.permute.xlu1 %652 }
 0x5bd   :  { %v657_v7 = vpop.permute.xlu0 %656  ;;  %2439 = vmatmul.mubr.msk.f32.vlgmr.msra.gmra.mrb[6].mxu0 %vm299_vm4, %v653_v4 }
 0x5be   :  { %v659_v9 = vsel %vm299_vm4, %v653_v4, %v657_v7  ;;  %2654 = vmatpush3.bf16.msra.mxu0 %v3184_v12  ;;  %2457 = vmatprep.mubr.msk.f32.mxu0 %vm2998_vm0, %v2999_v6 }
 0x5bf   :  { %2428 = vmatmul.mubr.msk.f32.vlgmr.msra.gmra.mrb[2].mxu1 %vm417_vm5, %v659_v9  ;;  %2655 = vmatprep.subr.bf16.mxu0 %v2997_v5 }
 0x5c0   :  { %2666 = vmatpush3.bf16.msra.mxu1 %v3134_v26  ;;  %2468 = vmatprep.mubr.msk.f32.mxu1 %vm2998_vm0, %v2999_v6 }
 0x5c1   :  { %2667 = vmatprep.subr.bf16.mxu1 %v2997_v5 }
 0x5c2   :  { %2657 = vmatpush3.bf16.msra.mxu0 %v3187_v14 }
 0x5c3   :  { %2658 = vmatprep.subr.bf16.mxu0 %v2997_v5 }
 0x5c4   :  { %2669 = vmatpush3.bf16.msra.mxu1 %v3150_v34 }
 0x5c5   :  { %2670 = vmatprep.subr.bf16.mxu1 %v2997_v5 }
 0x5c6   :  { %2660 = vmatpush3.bf16.msra.mxu0 %v3191_v17 }
 0x5c7   :  { %2661 = vmatprep.subr.bf16.mxu0 %v2997_v5 }
 0x5ca   :  { %2663 = vmatpush3.bf16.msra.mxu0 %v3196_v21 }
 0x5cb   :  { %2682 = vmatprep.subr.bf16.mxu0 %v2997_v5 }
 0x690   :  { %v852_v11 = vpop.f32.mrb[6].mxu0 }
 0x691   :  { %v856_v13 = vadd.f32 %v852_v11, %v783_v10  ;;  %v2440_v15 = vpop.f32.mrb[7].mxu0 }
 0x692   :  { %v729_v16 = vpop.f32.mrb[2].mxu1 }
 0x693   :  { %2814 = vtanh.f32 %v856_v13  ;;  %v730_v18 = vadd.f32 %v3229_v30, %v729_v16  ;;  %v2429_v19 = vpop.f32.mrb[3].mxu1  ;;  %v2226_v23 = vmul.f32 -1.442695, %v856_v13 }
 0x695   :  { %2816 = vtanh.f32 %v730_v18  ;;  %v2224_v24 = vmul.f32 -1.442695, %v730_v18 }
 0x696   :  { %2818 = vpow2.f32 %v2226_v23 }
 0x697   :  { %2820 = vpow2.f32 %v2224_v24 }
 0x69d   :  { %v2815_v20 = vpop.eup %2814 }
 0x69e   :  { %866 = vrot.lane.b32.xlu0 %v2815_v20, %s3000_s4 }
 0x69f   :  { %v2817_v22 = vpop.eup %2816 }
 0x6a0   :  { %742 = vrot.lane.b32.xlu1 %v2817_v22, %s3000_s4  ;;  %v2819_v25 = vpop.eup %2818 }
 0x6a1   :  { %v2821_v27 = vpop.eup %2820  ;;  %v860_v28 = vadd.f32 1.0, %v2819_v25 }
 0x6a2   :  { %v736_v29 = vadd.f32 1.0, %v2821_v27 }
 0x6a3   :  { %2822 = vrcp.f32 %v860_v28 }
 0x6a4   :  { %2824 = vrcp.f32 %v736_v29 }
 0x6ad   :  { %v2823_v31 = vpop.eup %2822 }
 0x6ae   :  { %v2825_v35 = vpop.eup %2824  ;;  %v864_v38 = vmul.f32 %v2823_v31, %v3238_v58 }
 0x6af   :  { %v740_v41 = vmul.f32 %v2825_v35, %v3240_v60 }
 0x710   :  { %v867_v32 = vpop.permute.xlu0 %866 }
 0x711   :  { %v869_v33 = vmul.f32 %v2823_v31, %v867_v32 }
 0x712   :  { %v743_v36 = vpop.permute.xlu1 %742 }
 0x713   :  { %871 = vrot.lane.b32.xlu0 %v869_v33, %s3000_s4  ;;  %v745_v37 = vmul.f32 %v2825_v35, %v743_v36 }
 0x715   :  { %747 = vrot.lane.b32.xlu1 %v745_v37, %s3000_s4  ;;  %v1243_v37 = vld [vmem:[#allocation4 + $0x8] sm:$0x3] }
 0x785   :  { %v872_v39 = vpop.permute.xlu0 %871 }
 0x786   :  { %v3276_v40 = vadd.f32 %v872_v39, %v864_v38 }
 0x787   :  { %v748_v42 = vpop.permute.xlu1 %747 }
 0x788   :  { %2826 = vtanh.f32 %v3276_v40  ;;  %v3280_v43 = vadd.f32 %v748_v42, %v740_v41 }
 0x78a   :  { %2828 = vtanh.f32 %v3280_v43 }
 0x792   :  { %v2827_v44 = vpop.eup %2826 }
 0x793   :  { %877 = vrot.lane.b32.xlu0 %v2827_v44, %s3000_s4 }
 0x794   :  { %v2829_v45 = vpop.eup %2828 }
 0x795   :  { %753 = vrot.lane.b32.xlu1 %v2829_v45, %s3000_s4 }
 0x805   :  { %v878_v46 = vpop.permute.xlu0 %877 }
 0x806   :  { %v880_v47 = vmul.f32 %v2823_v31, %v878_v46 }
 0x807   :  { %v754_v48 = vpop.permute.xlu1 %753 }
 0x808   :  { %882 = vrot.lane.b32.xlu1 %v880_v47, %s3001_s7  ;;  %v3286_v49 = vmul.f32 %v2825_v35, %v754_v48 }
 0x80a   :  { %886 = vrot.lane.b32.xlu0 %v3286_v49, %s3002_s6 }
 0x87a   :  { %v883_v50 = vpop.permute.xlu1 %882 }
 0x87b   :  { %2469 = vmatmul.mubr.msk.f32.vlgmr.msra.gmra.mrb[4].mxu1 %vm299_vm4, %v883_v50 }
 0x87c   :  { %2672 = vmatpush3.bf16.msra.mxu1 %v3184_v12  ;;  %2487 = vmatprep.mubr.msk.f32.mxu1 %vm2998_vm0, %v2999_v6  ;;  %v887_v51 = vpop.permute.xlu0 %886 }
 0x87d   :  { %2673 = vmatprep.subr.bf16.mxu1 %v2997_v5  ;;  %v889_v52 = vsel %vm299_vm4, %v883_v50, %v887_v51 }
 0x87e   :  { %2458 = vmatmul.mubr.msk.f32.vlgmr.msra.gmra.mrb[8].mxu0 %vm417_vm5, %v889_v52 }
 0x87f   :  { %2684 = vmatpush3.bf16.msra.mxu0 %v3134_v26  ;;  %2498 = vmatprep.mubr.msk.f32.mxu0 %vm2998_vm0, %v2999_v6 }
 0x880   :  { %2675 = vmatpush3.bf16.msra.mxu1 %v3187_v14  ;;  %2685 = vmatprep.subr.bf16.mxu0 %v2997_v5 }
 0x881   :  { %2676 = vmatprep.subr.bf16.mxu1 %v2997_v5 }
 0x883   :  { %2687 = vmatpush3.bf16.msra.mxu0 %v3150_v34 }
 0x884   :  { %2678 = vmatpush3.bf16.msra.mxu1 %v3191_v17  ;;  %2688 = vmatprep.subr.bf16.mxu0 %v2997_v5 }
 0x885   :  { %2679 = vmatprep.subr.bf16.mxu1 %v2997_v5 }
 0x888   :  { %2681 = vmatpush3.bf16.msra.mxu1 %v3196_v21 }
 0x889   :  { %2700 = vmatprep.subr.bf16.mxu1 %v2997_v5 }
 0x94e   :  { %v1082_v54 = vpop.f32.mrb[4].mxu1 }
 0x94f   :  { %v1086_v55 = vadd.f32 %v1082_v54, %v1013_v53  ;;  %v2470_v56 = vpop.f32.mrb[5].mxu1 }
 0x951   :  { %2830 = vtanh.f32 %v1086_v55  ;;  %v959_v57 = vpop.f32.mrb[8].mxu0  ;;  %v2230_v62 = vmul.f32 -1.442695, %v1086_v55 }
 0x952   :  { %v960_v58 = vadd.f32 %v3229_v30, %v959_v57  ;;  %v2459_v59 = vpop.f32.mrb[9].mxu0 }
 0x954   :  { %2832 = vtanh.f32 %v960_v58  ;;  %v2228_v63 = vmul.f32 -1.442695, %v960_v58 }
 0x955   :  { %2834 = vpow2.f32 %v2230_v62 }
 0x956   :  { %2836 = vpow2.f32 %v2228_v63 }
 0x95b   :  { %v2831_v60 = vpop.eup %2830 }
 0x95c   :  { %1096 = vrot.lane.b32.xlu0 %v2831_v60, %s3000_s4 }
 0x95e   :  { %v2833_v61 = vpop.eup %2832 }
 0x95f   :  { %972 = vrot.lane.b32.xlu1 %v2833_v61, %s3000_s4  ;;  %v2835_v0 = vpop.eup %2834 }
 0x960   :  { %v1090_v2 = vadd.f32 1.0, %v2835_v0  ;;  %v2837_v4 = vpop.eup %2836 }
 0x961   :  { %v966_v7 = vadd.f32 1.0, %v2837_v4 }
 0x962   :  { %2838 = vrcp.f32 %v1090_v2 }
 0x963   :  { %2840 = vrcp.f32 %v966_v7 }
 0x96c   :  { %v2839_v9 = vpop.eup %2838 }
 0x96d   :  { %v2841_v13 = vpop.eup %2840  ;;  %v1094_v18 = vmul.f32 %v2839_v9, %v3276_v40 }
 0x96e   :  { %v970_v22 = vmul.f32 %v2841_v13, %v3280_v43 }
 0x9ce   :  { %v1097_v10 = vpop.permute.xlu0 %1096 }
 0x9cf   :  { %v1099_v11 = vmul.f32 %v2839_v9, %v1097_v10 }
 0x9d1   :  { %1101 = vrot.lane.b32.xlu0 %v1099_v11, %s3000_s4  ;;  %v973_v15 = vpop.permute.xlu1 %972 }
 0x9d2   :  { %v975_v16 = vmul.f32 %v2841_v13, %v973_v15 }
 0x9d4   :  { %977 = vrot.lane.b32.xlu1 %v975_v16, %s3000_s4 }
 0xa43   :  { %v1102_v19 = vpop.permute.xlu0 %1101 }
 0xa44   :  { %v3315_v20 = vadd.f32 %v1102_v19, %v1094_v18  ;;  %v1473_v18 = vld [vmem:[#allocation4 + $0xa] sm:$0x3] }
 0xa46   :  { %2842 = vtanh.f32 %v3315_v20  ;;  %v978_v23 = vpop.permute.xlu1 %977 }
 0xa47   :  { %v3319_v24 = vadd.f32 %v978_v23, %v970_v22 }
 0xa49   :  { %2844 = vtanh.f32 %v3319_v24 }
 0xa50   :  { %v2843_v25 = vpop.eup %2842 }
 0xa51   :  { %1107 = vrot.lane.b32.xlu0 %v2843_v25, %s3000_s4 }
 0xa53   :  { %v2845_v27 = vpop.eup %2844 }
 0xa54   :  { %983 = vrot.lane.b32.xlu1 %v2845_v27, %s3000_s4 }
 0xac3   :  { %v1108_v28 = vpop.permute.xlu0 %1107 }
 0xac4   :  { %v1110_v29 = vmul.f32 %v2839_v9, %v1108_v28 }
 0xac6   :  { %1112 = vrot.lane.b32.xlu1 %v1110_v29, %s3001_s7  ;;  %v984_v31 = vpop.permute.xlu1 %983 }
 0xac7   :  { %v3325_v32 = vmul.f32 %v2841_v13, %v984_v31 }
 0xac9   :  { %1116 = vrot.lane.b32.xlu0 %v3325_v32, %s3002_s6 }
 0xb38   :  { %v1113_v33 = vpop.permute.xlu1 %1112 }
 0xb39   :  { %2499 = vmatmul.mubr.msk.f32.vlgmr.msra.gmra.mrb[10].mxu0 %vm299_vm4, %v1113_v33 }
 0xb3a   :  { %2690 = vmatpush3.bf16.msra.mxu0 %v3184_v12  ;;  %2517 = vmatprep.mubr.msk.f32.mxu0 %vm2998_vm0, %v2999_v6 }
 0xb3b   :  { %2691 = vmatprep.subr.bf16.mxu0 %v2997_v5  ;;  %v1117_v35 = vpop.permute.xlu0 %1116 }
 0xb3c   :  { %v1119_v36 = vsel %vm299_vm4, %v1113_v33, %v1117_v35 }
 0xb3d   :  { %2488 = vmatmul.mubr.msk.f32.vlgmr.msra.gmra.mrb[6].mxu1 %vm417_vm5, %v1119_v36 }
 0xb3e   :  { %2693 = vmatpush3.bf16.msra.mxu0 %v3187_v14  ;;  %2702 = vmatpush3.bf16.msra.mxu1 %v3134_v26 }
 0xb3f   :  { %2694 = vmatprep.subr.bf16.mxu0 %v2997_v5  ;;  %2703 = vmatprep.subr.bf16.mxu1 %v2997_v5 }
 0xb40   :  { %2528 = vmatprep.mubr.msk.f32.mxu1 %vm2998_vm0, %v2999_v6 }
 0xb42   :  { %2696 = vmatpush3.bf16.msra.mxu0 %v3191_v17  ;;  %2705 = vmatpush3.bf16.msra.mxu1 %v3150_v34 }
 0xb43   :  { %2697 = vmatprep.subr.bf16.mxu0 %v2997_v5  ;;  %2706 = vmatprep.subr.bf16.mxu1 %v2997_v5 }
 0xb46   :  { %2699 = vmatpush3.bf16.msra.mxu0 %v3196_v21 }
 0xb47   :  { %2718 = vmatprep.subr.bf16.mxu0 %v2997_v5 }
 0xc0c   :  { %v1312_v38 = vpop.f32.mrb[10].mxu0 }
 0xc0d   :  { %v1316_v39 = vadd.f32 %v1312_v38, %v1243_v37  ;;  %v2500_v40 = vpop.f32.mrb[11].mxu0 }
 0xc0f   :  { %2846 = vtanh.f32 %v1316_v39  ;;  %v2234_v46 = vmul.f32 -1.442695, %v1316_v39 }
 0xc10   :  { %v1189_v41 = vpop.f32.mrb[6].mxu1 }
 0xc11   :  { %v1190_v42 = vadd.f32 %v3229_v30, %v1189_v41  ;;  %v2489_v43 = vpop.f32.mrb[7].mxu1 }
 0xc13   :  { %2848 = vtanh.f32 %v1190_v42  ;;  %v2232_v47 = vmul.f32 -1.442695, %v1190_v42 }
 0xc14   :  { %2850 = vpow2.f32 %v2234_v46 }
 0xc15   :  { %2852 = vpow2.f32 %v2232_v47 }
 0xc19   :  { %v2847_v44 = vpop.eup %2846 }
 0xc1a   :  { %1326 = vrot.lane.b32.xlu0 %v2847_v44, %s3000_s4 }
 0xc1d   :  { %v2849_v45 = vpop.eup %2848 }
 0xc1e   :  { %1202 = vrot.lane.b32.xlu1 %v2849_v45, %s3000_s4  ;;  %v2851_v48 = vpop.eup %2850 }
 0xc1f   :  { %v1320_v50 = vadd.f32 1.0, %v2851_v48  ;;  %v2853_v51 = vpop.eup %2852 }
 0xc20   :  { %v1196_v52 = vadd.f32 1.0, %v2853_v51 }
 0xc21   :  { %2854 = vrcp.f32 %v1320_v50 }
 0xc22   :  { %2856 = vrcp.f32 %v1196_v52 }
 0xc2b   :  { %v2855_v53 = vpop.eup %2854 }
 0xc2c   :  { %v2857_v56 = vpop.eup %2856  ;;  %v1324_v59 = vmul.f32 %v2855_v53, %v3315_v20 }
 0xc2d   :  { %v1200_v62 = vmul.f32 %v2857_v56, %v3319_v24 }
 0xc8c   :  { %v1327_v54 = vpop.permute.xlu0 %1326 }
 0xc8d   :  { %v1329_v55 = vmul.f32 %v2855_v53, %v1327_v54 }
 0xc8f   :  { %1331 = vrot.lane.b32.xlu0 %v1329_v55, %s3000_s4 }
 0xc90   :  { %v1203_v57 = vpop.permute.xlu1 %1202 }
 0xc91   :  { %v1205_v58 = vmul.f32 %v2857_v56, %v1203_v57 }
 0xc93   :  { %1207 = vrot.lane.b32.xlu1 %v1205_v58, %s3000_s4 }
 0xd01   :  { %v1332_v60 = vpop.permute.xlu0 %1331 }
 0xd02   :  { %v3354_v61 = vadd.f32 %v1332_v60, %v1324_v59  ;;  %v1703_v60 = vld [vmem:[#allocation4 + $0xc] sm:$0x3] }
 0xd04   :  { %2858 = vtanh.f32 %v3354_v61 }
 0xd05   :  { %v1208_v63 = vpop.permute.xlu1 %1207 }
 0xd06   :  { %v3358_v0 = vadd.f32 %v1208_v63, %v1200_v62 }
 0xd08   :  { %2860 = vtanh.f32 %v3358_v0 }
 0xd0e   :  { %v2859_v2 = vpop.eup %2858 }
 0xd0f   :  { %1337 = vrot.lane.b32.xlu0 %v2859_v2, %s3000_s4 }
 0xd12   :  { %v2861_v4 = vpop.eup %2860 }
 0xd13   :  { %1213 = vrot.lane.b32.xlu1 %v2861_v4, %s3000_s4 }
 0xd81   :  { %v1338_v7 = vpop.permute.xlu0 %1337 }
 0xd82   :  { %v1340_v9 = vmul.f32 %v2855_v53, %v1338_v7 }
 0xd84   :  { %1342 = vrot.lane.b32.xlu1 %v1340_v9, %s3001_s7 }
 0xd85   :  { %v1214_v10 = vpop.permute.xlu1 %1213 }
 0xd86   :  { %v3364_v11 = vmul.f32 %v2857_v56, %v1214_v10 }
 0xd88   :  { %1346 = vrot.lane.b32.xlu0 %v3364_v11, %s3002_s6 }
 0xdf6   :  { %v1343_v13 = vpop.permute.xlu1 %1342 }
 0xdf7   :  { %2529 = vmatmul.mubr.msk.f32.vlgmr.msra.gmra.mrb[8].mxu1 %vm299_vm4, %v1343_v13 }
 0xdf8   :  { %2708 = vmatpush3.bf16.msra.mxu1 %v3184_v12  ;;  %2547 = vmatprep.mubr.msk.f32.mxu1 %vm2998_vm0, %v2999_v6 }
 0xdf9   :  { %2709 = vmatprep.subr.bf16.mxu1 %v2997_v5 }
 0xdfa   :  { %v1347_v15 = vpop.permute.xlu0 %1346 }
 0xdfb   :  { %v1349_v16 = vsel %vm299_vm4, %v1343_v13, %v1347_v15 }
 0xdfc   :  { %2711 = vmatpush3.bf16.msra.mxu1 %v3187_v14  ;;  %2518 = vmatmul.mubr.msk.f32.vlgmr.msra.gmra.mrb[12].mxu0 %vm417_vm5, %v1349_v16 }
 0xdfd   :  { %2712 = vmatprep.subr.bf16.mxu1 %v2997_v5  ;;  %2720 = vmatpush3.bf16.msra.mxu0 %v3134_v26 }
 0xdfe   :  { %2558 = vmatprep.mubr.msk.f32.mxu0 %vm2998_vm0, %v2999_v6  ;;  %2721 = vmatprep.subr.bf16.mxu0 %v2997_v5 }
 0xe00   :  { %2714 = vmatpush3.bf16.msra.mxu1 %v3191_v17 }
 0xe01   :  { %2715 = vmatprep.subr.bf16.mxu1 %v2997_v5  ;;  %2723 = vmatpush3.bf16.msra.mxu0 %v3150_v34 }
 0xe02   :  { %2724 = vmatprep.subr.bf16.mxu0 %v2997_v5 }
 0xe04   :  { %2717 = vmatpush3.bf16.msra.mxu1 %v3196_v21 }
 0xe05   :  { %2736 = vmatprep.subr.bf16.mxu1 %v2997_v5 }
 0xeca   :  { %v1542_v19 = vpop.f32.mrb[8].mxu1 }
 0xecb   :  { %v1546_v20 = vadd.f32 %v1542_v19, %v1473_v18  ;;  %v2530_v22 = vpop.f32.mrb[9].mxu1 }
 0xecd   :  { %2862 = vtanh.f32 %v1546_v20  ;;  %v2238_v29 = vmul.f32 -1.442695, %v1546_v20 }
 0xecf   :  { %v1419_v23 = vpop.f32.mrb[12].mxu0 }
 0xed0   :  { %v1420_v24 = vadd.f32 %v3229_v30, %v1419_v23  ;;  %v2519_v25 = vpop.f32.mrb[13].mxu0 }
 0xed2   :  { %2864 = vtanh.f32 %v1420_v24  ;;  %v2236_v31 = vmul.f32 -1.442695, %v1420_v24 }
 0xed3   :  { %2866 = vpow2.f32 %v2238_v29 }
 0xed4   :  { %2868 = vpow2.f32 %v2236_v31 }
 0xed7   :  { %v2863_v27 = vpop.eup %2862 }
 0xed8   :  { %1556 = vrot.lane.b32.xlu0 %v2863_v27, %s3000_s4 }
 0xedc   :  { %v2865_v28 = vpop.eup %2864 }
 0xedd   :  { %1432 = vrot.lane.b32.xlu1 %v2865_v28, %s3000_s4  ;;  %v2867_v33 = vpop.eup %2866 }
 0xede   :  { %v1550_v35 = vadd.f32 1.0, %v2867_v33  ;;  %v2869_v36 = vpop.eup %2868 }
 0xedf   :  { %v1426_v37 = vadd.f32 1.0, %v2869_v36 }
 0xee0   :  { %2870 = vrcp.f32 %v1550_v35 }
 0xee1   :  { %2872 = vrcp.f32 %v1426_v37 }
 0xeea   :  { %v2871_v38 = vpop.eup %2870 }
 0xeeb   :  { %v2873_v41 = vpop.eup %2872  ;;  %v1554_v44 = vmul.f32 %v2871_v38, %v3354_v61 }
 0xeec   :  { %v1430_v47 = vmul.f32 %v2873_v41, %v3358_v0 }
 0xf4a   :  { %v1557_v39 = vpop.permute.xlu0 %1556 }
 0xf4b   :  { %v1559_v40 = vmul.f32 %v2871_v38, %v1557_v39 }
 0xf4d   :  { %1561 = vrot.lane.b32.xlu0 %v1559_v40, %s3000_s4 }
 0xf4f   :  { %v1433_v42 = vpop.permute.xlu1 %1432 }
 0xf50   :  { %v1435_v43 = vmul.f32 %v2873_v41, %v1433_v42 }
 0xf52   :  { %1437 = vrot.lane.b32.xlu1 %v1435_v43, %s3000_s4 }
 0xfbf   :  { %v1562_v45 = vpop.permute.xlu0 %1561 }
 0xfc0   :  { %v3393_v46 = vadd.f32 %v1562_v45, %v1554_v44 }
 0xfc2   :  { %2874 = vtanh.f32 %v3393_v46 }
 0xfc4   :  { %v1438_v48 = vpop.permute.xlu1 %1437 }
 0xfc5   :  { %v3397_v50 = vadd.f32 %v1438_v48, %v1430_v47 }
 0xfc7   :  { %2876 = vtanh.f32 %v3397_v50 }
 0xfcc   :  { %v2875_v51 = vpop.eup %2874 }
 0xfcd   :  { %1567 = vrot.lane.b32.xlu0 %v2875_v51, %s3000_s4 }
 0xfd1   :  { %v2877_v52 = vpop.eup %2876 }
 0xfd2   :  { %1443 = vrot.lane.b32.xlu1 %v2877_v52, %s3000_s4 }
0x103f   :  { %v1568_v53 = vpop.permute.xlu0 %1567 }
0x1040   :  { %v1570_v54 = vmul.f32 %v2871_v38, %v1568_v53 }
0x1042   :  { %1572 = vrot.lane.b32.xlu1 %v1570_v54, %s3001_s7 }
0x1044   :  { %v1444_v55 = vpop.permute.xlu1 %1443 }
0x1045   :  { %v3403_v56 = vmul.f32 %v2873_v41, %v1444_v55 }
0x1047   :  { %1576 = vrot.lane.b32.xlu0 %v3403_v56, %s3002_s6 }
0x10b4   :  { %v1573_v57 = vpop.permute.xlu1 %1572 }
0x10b5   :  { %2559 = vmatmul.mubr.msk.f32.vlgmr.msra.gmra.mrb[14].mxu0 %vm299_vm4, %v1573_v57 }
0x10b6   :  { %2726 = vmatpush3.bf16.msra.mxu0 %v3184_v12  ;;  %2577 = vmatprep.mubr.msk.f32.mxu0 %vm2998_vm0, %v2999_v6 }
0x10b7   :  { %2727 = vmatprep.subr.bf16.mxu0 %v2997_v5 }
0x10b9   :  { %v1577_v58 = vpop.permute.xlu0 %1576 }
0x10ba   :  { %2729 = vmatpush3.bf16.msra.mxu0 %v3187_v14  ;;  %v1579_v59 = vsel %vm299_vm4, %v1573_v57, %v1577_v58 }
0x10bb   :  { %2730 = vmatprep.subr.bf16.mxu0 %v2997_v5  ;;  %2548 = vmatmul.mubr.msk.f32.vlgmr.msra.gmra.mrb[10].mxu1 %vm417_vm5, %v1579_v59 }
0x10bc   :  { %2738 = vmatpush3.bf16.msra.mxu1 %v3134_v26  ;;  %2588 = vmatprep.mubr.msk.f32.mxu1 %vm2998_vm0, %v2999_v6 }
0x10bd   :  { %2739 = vmatprep.subr.bf16.mxu1 %v2997_v5 }
0x10be   :  { %2732 = vmatpush3.bf16.msra.mxu0 %v3191_v17 }
0x10bf   :  { %2733 = vmatprep.subr.bf16.mxu0 %v2997_v5 }
0x10c0   :  { %2741 = vmatpush3.bf16.msra.mxu1 %v3150_v34 }
0x10c1   :  { %2742 = vmatprep.subr.bf16.mxu1 %v2997_v5 }
0x10c2   :  { %2735 = vmatpush3.bf16.msra.mxu0 %v3196_v21 }
0x1188   :  { %v1772_v61 = vpop.f32.mrb[14].mxu0 }
0x1189   :  { %v1776_v62 = vadd.f32 %v1772_v61, %v1703_v60  ;;  %v2560_v63 = vpop.f32.mrb[15].mxu0 }
0x118b   :  { %2878 = vtanh.f32 %v1776_v62  ;;  %v2242_v34 = vmul.f32 -1.442695, %v1776_v62 }
0x118e   :  { %v1649_v26 = vpop.f32.mrb[10].mxu1 }
0x118f   :  { %v1650_v0 = vadd.f32 %v3229_v30, %v1649_v26  ;;  %v2549_v2 = vpop.f32.mrb[11].mxu1 }
0x1191   :  { %2880 = vtanh.f32 %v1650_v0  ;;  %v2240_v9 = vmul.f32 -1.442695, %v1650_v0 }
0x1192   :  { %2882 = vpow2.f32 %v2242_v34 }
0x1193   :  { %2884 = vpow2.f32 %v2240_v9 }
0x1195   :  { %v2879_v4 = vpop.eup %2878 }
0x1196   :  { %1786 = vrot.lane.b32.xlu0 %v2879_v4, %s3000_s4 }
0x119b   :  { %v2881_v7 = vpop.eup %2880 }
0x119c   :  { %1662 = vrot.lane.b32.xlu1 %v2881_v7, %s3000_s4  ;;  %v2883_v10 = vpop.eup %2882 }
0x119d   :  { %v1780_v13 = vadd.f32 1.0, %v2883_v10  ;;  %v2885_v15 = vpop.eup %2884 }
0x119e   :  { %v1656_v16 = vadd.f32 1.0, %v2885_v15 }
0x119f   :  { %2886 = vrcp.f32 %v1780_v13 }
0x11a0   :  { %2888 = vrcp.f32 %v1656_v16 }
0x11a9   :  { %v2887_v18 = vpop.eup %2886 }
0x11aa   :  { %v2889_v22 = vpop.eup %2888  ;;  %v1784_v25 = vmul.f32 %v2887_v18, %v3393_v46 }
0x11ab   :  { %v1660_v29 = vmul.f32 %v2889_v22, %v3397_v50 }
0x1208   :  { %v1787_v19 = vpop.permute.xlu0 %1786 }
0x1209   :  { %v1789_v20 = vmul.f32 %v2887_v18, %v1787_v19 }
0x120b   :  { %1791 = vrot.lane.b32.xlu0 %v1789_v20, %s3000_s4 }
0x120e   :  { %v1663_v23 = vpop.permute.xlu1 %1662 }
0x120f   :  { %v1665_v24 = vmul.f32 %v2889_v22, %v1663_v23  ;;  %v519_v23 = vld [vmem:[#allocation6] sm:$0x1] }
0x1211   :  { %1667 = vrot.lane.b32.xlu1 %v1665_v24, %s3000_s4  ;;  %v758_v24 = vld [vmem:[#allocation6 + $0x1] sm:$0x1] }
0x127d   :  { %v1792_v27 = vpop.permute.xlu0 %1791 }
0x127e   :  { %v1794_v28 = vadd.f32 %v1792_v27, %v1784_v25  ;;  %v520_v25 = vunpack.c.l.bf16 %v519_v23  ;;  %v759_v27 = vunpack.c.l.bf16 %v758_v24 }
0x1280   :  { %2890 = vtanh.f32 %v1794_v28 }
0x1283   :  { %v1668_v31 = vpop.permute.xlu1 %1667 }
0x1284   :  { %v1670_v33 = vadd.f32 %v1668_v31, %v1660_v29  ;;  %v767_v29 = vrot.slane %v759_v27, %v3096_v8 }
0x1286   :  { %2892 = vtanh.f32 %v1670_v33 }
0x128a   :  { %v2891_v35 = vpop.eup %2890 }
0x128b   :  { %1797 = vrot.lane.b32.xlu0 %v2891_v35, %s3000_s4 }
0x1290   :  { %v2893_v36 = vpop.eup %2892 }
0x1291   :  { %1673 = vrot.lane.b32.xlu1 %v2893_v36, %s3000_s4 }
0x12fd   :  { %v1798_v37 = vpop.permute.xlu0 %1797 }
0x12fe   :  { %v1800_v38 = vmul.f32 %v2887_v18, %v1798_v37 }
0x1300   :  { %1802 = vrot.lane.b32.xlu1 %v1800_v38, %s3001_s7 }
0x1303   :  { %v1674_v39 = vpop.permute.xlu1 %1673 }
0x1304   :  { %v3435_v40 = vmul.f32 %v2889_v22, %v1674_v39 }
0x1306   :  { %1806 = vrot.lane.b32.xlu0 %v3435_v40, %s3002_s6 }
0x1372   :  { %v1803_v41 = vpop.permute.xlu1 %1802 }
0x1373   :  { %2589 = vmatmul.mubr.msk.f32.vlgmr.msra.gmra.mrb[12].mxu1 %vm299_vm4, %v1803_v41 }
0x1374   :  { %2744 = vmatpush3.bf16.msra.mxu1 %v3184_v12  ;;  %2607 = vmatprep.mubr.msk.f32.mxu1 %vm2998_vm0, %v2999_v6  ;;  %v1933_v12 = vld [vmem:[#allocation4 + $0xe] sm:$0x3] }
0x1375   :  { %2745 = vmatprep.subr.bf16.mxu1 %v2997_v5 }
0x1378   :  { %2747 = vmatpush3.bf16.msra.mxu1 %v3187_v14  ;;  %v1807_v42 = vpop.permute.xlu0 %1806 }
0x1379   :  { %2748 = vmatprep.subr.bf16.mxu1 %v2997_v5  ;;  %v1809_v43 = vsel %vm299_vm4, %v1803_v41, %v1807_v42  ;;  %v2220_v41 = vld [vmem:[%s3574_s9] ss:$0 sm:$0xff]  ;;  %s3004_s9 = smov [#allocation11]  }
0x137a   :  { %2578 = vmatmul.mubr.msk.f32.vlgmr.msra.gmra.mrb[16].mxu0 %vm417_vm5, %v1809_v43  ;;  %s2197_s18 = sshll.u32 %s3004_s9, 4  ;;  %s2198_s18 = int_to_ptr.vmem [resolvable:$true] %s2197_s18 }
0x137b   :  { %s2962_s19 = scalar_lea.vmem %s2198_s18, 32  ;;  %p2967_p3 = scmp.lt.s32.totalorder %s2198_s18, %s2198_s18 }
0x137c   :  { %2750 = vmatpush3.bf16.msra.mxu1 %v3191_v17  ;;  %p2963_p2 = scmp.ne.s32.totalorder %s2198_s18, %s2962_s19  ;;  %p2968_p4 = scmp.lt.s32.totalorder %s2962_s19, %s2962_s19 }
0x137d   :  { %2751 = vmatprep.subr.bf16.mxu1 %v2997_v5 }
0x137e   :  { %p2969_p5 = por %p2968_p4, %p2967_p3 }
0x1380   :  { %2753 = vmatpush3.bf16.msra.mxu1 %v3196_v21  ;;  %p2970_p6 = pnand %p2969_p5, %p2963_p2 }
0x1446   :  { %v2002_v44 = vpop.f32.mrb[12].mxu1 }
0x1447   :  { %v2006_v6 = vadd.f32 %v2002_v44, %v1933_v12  ;;  %v2590_v45 = vpop.f32.mrb[13].mxu1 }
0x1449   :  { %2894 = vtanh.f32 %v2006_v6  ;;  %v2246_v17 = vmul.f32 -1.442695, %v2006_v6 }
0x144d   :  { %v1879_v46 = vpop.f32.mrb[16].mxu0 }
0x144e   :  { %v1880_v14 = vadd.f32 %v3229_v30, %v1879_v46  ;;  %v2579_v47 = vpop.f32.mrb[17].mxu0 }
0x1450   :  { %2896 = vtanh.f32 %v1880_v14  ;;  %v2244_v5 = vmul.f32 -1.442695, %v1880_v14 }
0x1451   :  { %2898 = vpow2.f32 %v2246_v17 }
0x1452   :  { %2900 = vpow2.f32 %v2244_v5 }
0x1453   :  { %v2895_v48 = vpop.eup %2894 }
0x1454   :  { %2016 = vrot.lane.b32.xlu0 %v2895_v48, %s3000_s4 }
0x145a   :  { %v2897_v50 = vpop.eup %2896 }
0x145b   :  { %1892 = vrot.lane.b32.xlu1 %v2897_v50, %s3000_s4  ;;  %v2899_v21 = vpop.eup %2898 }
0x145c   :  { %v2010_v51 = vadd.f32 1.0, %v2899_v21  ;;  %v2901_v52 = vpop.eup %2900  ;;  %v1678_v21 = vld [vmem:[#allocation6 + $0x5] sm:$0x1] }
0x145d   :  { %v1886_v53 = vadd.f32 1.0, %v2901_v52  ;;  %v1218_v52 = vld [vmem:[#allocation6 + $0x3] sm:$0x1] }
0x145e   :  { %2902 = vrcp.f32 %v2010_v51  ;;  %v988_v51 = vld [vmem:[#allocation6 + $0x2] sm:$0x1] }
0x145f   :  { %2904 = vrcp.f32 %v1886_v53 }
0x1468   :  { %v2903_v54 = vpop.eup %2902 }
0x1469   :  { %v2905_v58 = vpop.eup %2904  ;;  %v2014_v61 = vmul.f32 %v2903_v54, %v1794_v28  ;;  %v528_v28 = vrot.slane %v520_v25, %v3096_v8 }
0x146a   :  { %v1890_v26 = vmul.f32 %v2905_v58, %v1670_v33 }
0x146b   :  { %v2769_v33 = vpack.i.bf16 %v767_v29, %v528_v28 }
0x14c6   :  { %v2017_v55 = vpop.permute.xlu0 %2016 }
0x14c7   :  { %v2019_v57 = vmul.f32 %v2903_v54, %v2017_v55  ;;  %v989_v55 = vunpack.c.l.bf16 %v988_v51 }
0x14c9   :  { %2021 = vrot.lane.b32.xlu0 %v2019_v57, %s3000_s4  ;;  %v1219_v57 = vunpack.c.l.bf16 %v1218_v52 }
0x14cd   :  { %v1893_v59 = vpop.permute.xlu1 %1892 }
0x14ce   :  { %v1895_v60 = vmul.f32 %v2905_v58, %v1893_v59 }
0x14d0   :  { %1897 = vrot.lane.b32.xlu1 %v1895_v60, %s3000_s4 }
0x153b   :  { %v2022_v62 = vpop.permute.xlu0 %2021 }
0x153c   :  { %v3456_v63 = vadd.f32 %v2022_v62, %v2014_v61  ;;  %v997_v61 = vrot.slane %v989_v55, %v3096_v8  ;;  %v1227_v62 = vrot.slane %v1219_v57, %v3096_v8 }
0x153e   :  { %2906 = vtanh.f32 %v3456_v63 }
0x1542   :  { %v1898_v0 = vpop.permute.xlu1 %1897 }
0x1543   :  { %v3459_v2 = vadd.f32 %v1898_v0, %v1890_v26  ;;  %v1908_v26 = vld [vmem:[#allocation6 + $0x6] sm:$0x1]  ;;  %v2138_v0 = vld [vmem:[#allocation6 + $0x7] sm:$0x1] }
0x1545   :  { %2908 = vtanh.f32 %v3459_v2 }
0x1548   :  { %v2907_v4 = vpop.eup %2906 }
0x1549   :  { %2027 = vrot.lane.b32.xlu0 %v2907_v4, %s3000_s4 }
0x154f   :  { %v2909_v7 = vpop.eup %2908 }
0x1550   :  { %1903 = vrot.lane.b32.xlu1 %v2909_v7, %s3000_s4  ;;  %v1909_v7 = vunpack.c.l.bf16 %v1908_v26 }
0x15bb   :  { %v2028_v34 = vpop.permute.xlu0 %2027 }
0x15bc   :  { %v2030_v9 = vmul.f32 %v2903_v54, %v2028_v34  ;;  %v1679_v54 = vunpack.c.l.bf16 %v1678_v21  ;;  %v2139_v34 = vunpack.c.l.bf16 %v2138_v0 }
0x15be   :  { %2032 = vrot.lane.b32.xlu1 %v2030_v9, %s3001_s7  ;;  %v1687_v60 = vrot.slane %v1679_v54, %v3096_v8  ;;  %v1917_v9 = vrot.slane %v1909_v7, %v3096_v8 }
0x15c2   :  { %v1904_v10 = vpop.permute.xlu1 %1903 }
0x15c3   :  { %v3465_v13 = vmul.f32 %v2905_v58, %v1904_v10  ;;  %v2147_v10 = vrot.slane %v2139_v34, %v3096_v8 }
0x15c5   :  { %2036 = vrot.lane.b32.xlu0 %v3465_v13, %s3002_s6 }
0x1630   :  { %v2033_v15 = vpop.permute.xlu1 %2032 }
0x1631   :  { %2162 = vst.msk [vmem:[#allocation2] sm:$0x3] %vm75_vm2, %v2033_v15 }
0x1637   :  { %v2037_v16 = vpop.permute.xlu0 %2036 }
0x1638   :  { %v2039_v18 = vsel %vm299_vm4, %v2033_v15, %v2037_v16  ;;  %v2784_v16 = vpack.i.bf16 %v2147_v10, %v1917_v9 }
0x1639   :  { %2608 = vmatmul.mubr.msk.f32.vlgmr.msra.gmra.mrb[14].mxu1 %vm417_vm5, %v2039_v18  ;;  %v3511_v18 = vand.u32 127, %v111_v1 }
0x163b   :  { %vm550_vm6 = vcmp.eq.s32.totalorder %v3511_v18, 0  ;;  %vm780_vm7 = vcmp.eq.s32.totalorder %v3511_v18, 1  ;;  %vm1010_vm8 = vcmp.eq.s32.totalorder %v3511_v18, 2  ;;  %vm1240_vm9 = vcmp.eq.s32.totalorder %v3511_v18, 3 }
0x163c   :  { %vm1470_vm10 = vcmp.eq.s32.totalorder %v3511_v18, 4  ;;  %vm1700_vm11 = vcmp.eq.s32.totalorder %v3511_v18, 5  ;;  %vm1930_vm12 = vcmp.eq.s32.totalorder %v3511_v18, 6  ;;  %vm2160_vm13 = vcmp.eq.s32.totalorder %v3511_v18, 7 }
0x170c   :  { %v2109_v19 = vpop.f32.mrb[14].mxu1 }
0x170d   :  { %v2110_v20 = vadd.f32 %v3229_v30, %v2109_v19  ;;  %v2609_v22 = vpop.f32.mrb[15].mxu1 }
0x170f   :  { %2910 = vtanh.f32 %v2110_v20  ;;  %v2248_v35 = vmul.f32 -1.442695, %v2110_v20 }
0x1711   :  { %2912 = vpow2.f32 %v2248_v35 }
0x1719   :  { %v2911_v31 = vpop.eup %2910 }
0x171a   :  { %2122 = vrot.lane.b32.xlu1 %v2911_v31, %s3000_s4 }
0x171b   :  { %v2913_v36 = vpop.eup %2912 }
0x171c   :  { %v2116_v30 = vadd.f32 1.0, %v2913_v36 }
0x171e   :  { %2770 = vrot.lane.b32.xlu1 %v2769_v33, %s3001_s7  ;;  %2914 = vrcp.f32 %v2116_v30 }
0x1728   :  { %v3477_v37 = vpop.eup %2914 }
0x178c   :  { %v2123_v38 = vpop.permute.xlu1 %2122 }
0x178d   :  { %v2125_v39 = vmul.f32 %v3477_v37, %v2123_v38 }
0x178f   :  { %2127 = vrot.lane.b32.xlu0 %v2125_v39, %s3000_s4 }
0x1790   :  { %v2771_v42 = vpop.permute.xlu1 %2770 }
0x1791   :  { %v2772_v43 = vunpack.i.l.bf16 %v2771_v42  ;;  %v2773_v44 = vunpack.i.h.bf16 %v2771_v42 }
0x1793   :  { %538 = vrot.lane.b32.xlu0 %v2220_v41, %s3001_s7  ;;  %v532_v6 = vmul.f32 %v2772_v43, %v3246_v3  ;;  %v771_v14 = vmul.f32 %v2773_v44, %v3286_v49  ;;  %v1448_v3 = vld [vmem:[#allocation6 + $0x4] sm:$0x1]  ;;  %v2120_v49 = vmul.f32 %v3477_v37, %v3459_v2  ;;  %v2774_v2 = vpack.i.bf16 %v1227_v62, %v997_v61 }
0x1794   :  { %v1449_v53 = vunpack.c.l.bf16 %v1448_v3 }
0x1796   :  { %v1457_v59 = vrot.slane %v1449_v53, %v3096_v8 }
0x1798   :  { %v2779_v4 = vpack.i.bf16 %v1687_v60, %v1457_v59 }
0x1801   :  { %v2128_v12 = vpop.permute.xlu0 %2127 }
0x1802   :  { %v3497_v58 = vadd.f32 %v2128_v12, %v2120_v49  ;;  %v2249_v49 = vld [vmem:[#allocation5] ss:$0 sm:$0xff] }
0x1804   :  { %2916 = vtanh.f32 %v3497_v58 }
0x1805   :  { %v3486_v45 = vpop.permute.xlu0 %538 }
0x1806   :  { %v541_v46 = vmul.f32 %v3486_v45, %v532_v6  ;;  %v772_v47 = vmul.f32 %v771_v14, %v3486_v45 }
0x1808   :  { %543 = vrot.lane.b32.xlu1 %v541_v46, %s3001_s7 }
0x180c   :  { %774 = vrot.lane.b32.xlu1 %v772_v47, %s3001_s7 }
0x180e   :  { %v2917_v15 = vpop.eup %2916 }
0x187a   :  { %v544_v48 = vpop.permute.xlu1 %543 }
0x187b   :  { %v547_v50 = vsel %vm75_vm2, %v544_v48, 0.0 }
0x187c   :  { %548 = vadd.xlane.f32.xlu0 %v547_v50 }
0x187e   :  { %v775_v17 = vpop.permute.xlu1 %774 }
0x187f   :  { %v777_v5 = vsel %vm75_vm2, %v775_v17, 0.0 }
0x1880   :  { %778 = vadd.xlane.f32.xlu1 %v777_v5 }
0x1891   :  { %2780 = vrot.lane.b32.xlu1 %v2779_v4, %s3001_s7 }
0x1892   :  { %2775 = vrot.lane.b32.xlu0 %v2774_v2, %s3001_s7 }
0x1896   :  { %2133 = vrot.lane.b32.xlu0 %v2917_v15, %s3000_s4 }
0x189a   :  { %2785 = vrot.lane.b32.xlu0 %v2784_v16, %s3001_s7 }
0x1909   :  { %v549_v19 = vpop.xlane.xlu0 %548 }
0x190a   :  { %v551_v20 = vsel %vm550_vm6, %v549_v19, 0.0 }
0x190d   :  { %v2776_v22 = vpop.permute.xlu0 %2775  ;;  %v779_v23 = vpop.xlane.xlu1 %778 }
0x190e   :  { %v2778_v24 = vunpack.i.h.bf16 %v2776_v22  ;;  %v2777_v25 = vunpack.i.l.bf16 %v2776_v22  ;;  %v781_v8 = vsel %vm780_vm7, %v779_v23, %v551_v20 }
0x1910   :  { %v1001_v27 = vmul.f32 %v2777_v25, %v3325_v32  ;;  %v1231_v28 = vmul.f32 %v2778_v24, %v3364_v11 }
0x1911   :  { %v2781_v31 = vpop.permute.xlu1 %2780  ;;  %v2134_v32 = vpop.permute.xlu0 %2133 }
0x1912   :  { %v1002_v29 = vmul.f32 %v1001_v27, %v3486_v45  ;;  %v1232_v1 = vmul.f32 %v1231_v28, %v3486_v45  ;;  %v2783_v38 = vunpack.i.h.bf16 %v2781_v31  ;;  %v2782_v11 = vunpack.i.l.bf16 %v2781_v31 }
0x1913   :  { %v2136_v14 = vmul.f32 %v3477_v37, %v2134_v32 }
0x1914   :  { %1004 = vrot.lane.b32.xlu1 %v1002_v29, %s3001_s7  ;;  %v1691_v41 = vmul.f32 %v2783_v38, %v3435_v40  ;;  %v1461_v42 = vmul.f32 %v2782_v11, %v3403_v56  ;;  %v3003_v40 = vmov 0  }
0x1915   :  { %v2786_v39 = vpop.permute.xlu0 %2785  ;;  %2789 = vset.pattern.permute.xlu0 %v3003_v40 }
0x1916   :  { %v2787_v43 = vunpack.i.l.bf16 %v2786_v39  ;;  %v1692_v12 = vmul.f32 %v1691_v41, %v3486_v45  ;;  %v2788_v44 = vunpack.i.h.bf16 %v2786_v39  ;;  %v1462_v46 = vmul.f32 %v1461_v42, %v3486_v45 }
0x1918   :  { %1234 = vrot.lane.b32.xlu1 %v1232_v1, %s3001_s7  ;;  %v1921_v6 = vmul.f32 %v2787_v43, %v3465_v13  ;;  %v2151_v47 = vmul.f32 %v2788_v44, %v2136_v14 }
0x191a   :  { %v1922_v48 = vmul.f32 %v1921_v6, %v3486_v45  ;;  %v2152_v56 = vmul.f32 %v2151_v47, %v3486_v45 }
0x1986   :  { %v1005_v33 = vpop.permute.xlu1 %1004 }
0x1987   :  { %v1007_v35 = vsel %vm75_vm2, %v1005_v33, 0.0 }
0x1988   :  { %1008 = vadd.xlane.f32.xlu0 %v1007_v35 }
0x198a   :  { %v1235_v36 = vpop.permute.xlu1 %1234 }
0x198b   :  { %v1237_v30 = vsel %vm75_vm2, %v1235_v36, 0.0 }
0x198c   :  { %1238 = vadd.xlane.f32.xlu1 %v1237_v30 }
0x199d   :  { %1694 = vrot.lane.b32.xlu1 %v1692_v12, %s3001_s7 }
0x199e   :  { %1464 = vrot.lane.b32.xlu0 %v1462_v46, %s3001_s7 }
0x19a2   :  { %1924 = vrot.lane.b32.xlu0 %v1922_v48, %s3001_s7 }
0x19a6   :  { %2154 = vrot.lane.b32.xlu0 %v2152_v56, %s3001_s7 }
0x1a15   :  { %v1009_v13 = vpop.xlane.xlu0 %1008 }
0x1a16   :  { %v1011_v50 = vsel %vm1010_vm8, %v1009_v13, %v781_v8 }
0x1a19   :  { %v1239_v37 = vpop.xlane.xlu1 %1238  ;;  %v1465_v17 = vpop.permute.xlu0 %1464 }
0x1a1a   :  { %v1241_v5 = vsel %vm1240_vm9, %v1239_v37, %v1011_v50  ;;  %v1467_v3 = vsel %vm75_vm2, %v1465_v17, 0.0 }
0x1a1b   :  { %1468 = vadd.xlane.f32.xlu1 %v1467_v3 }
0x1a1d   :  { %v1695_v21 = vpop.permute.xlu1 %1694  ;;  %v1925_v45 = vpop.permute.xlu0 %1924 }
0x1a1e   :  { %v1697_v51 = vsel %vm75_vm2, %v1695_v21, 0.0  ;;  %v1927_v52 = vsel %vm75_vm2, %v1925_v45, 0.0 }
0x1a1f   :  { %1698 = vadd.xlane.f32.xlu0 %v1697_v51 }
0x1a21   :  { %v2155_v53 = vpop.permute.xlu0 %2154 }
0x1a22   :  { %v2157_v54 = vsel %vm75_vm2, %v2155_v53, 0.0 }
0x1a23   :  { %1928 = vadd.xlane.f32.xlu0 %v1927_v52 }
0x1a2c   :  { %2169 = vrot.lane.b32.xlu1 %v2136_v14, %s3001_s7 }
0x1a39   :  { %2164 = vrot.lane.b32.xlu0 %v3456_v63, %s3002_s6 }
0x1a3d   :  { %2185 = vperm.xlu0 %2789, %v2249_v49  }
0x1a50   :  { %2158 = vadd.xlane.f32.xlu1 %v2157_v54 }
0x1a61   :  { %2174 = vrot.lane.b32.xlu1 %v3497_v58, %s3002_s6 }
0x1aa8   :  { %v1469_v55 = vpop.xlane.xlu1 %1468 }
0x1aa9   :  { %v1471_v63 = vsel %vm1470_vm10, %v1469_v55, %v1241_v5 }
0x1aac   :  { %v2170_v57 = vpop.permute.xlu1 %2169  ;;  %v1699_v59 = vpop.xlane.xlu0 %1698 }
0x1aad   :  { %2172 = vst.msk [vmem:[#allocation2 + $0x2] sm:$0x3] %vm75_vm2, %v2170_v57  ;;  %v1701_v62 = vsel %vm1700_vm11, %v1699_v59, %v1471_v63 }
0x1ab0   :  { %v1929_v60 = vpop.xlane.xlu0 %1928 }
0x1ab1   :  { %v1931_v26 = vsel %vm1930_vm12, %v1929_v60, %v1701_v62 }
0x1ab4   :  { %v2165_v61 = vpop.permute.xlu0 %2164 }
0x1ab5   :  { %2167 = vst.msk [vmem:[#allocation3] sm:$0x3] %vm75_vm2, %v2165_v61 }
0x1abc   :  { %v2186_v58 = vpop.permute.xlu0 %2185 }
0x1add   :  { %v2159_v0 = vpop.xlane.xlu1 %2158 }
0x1ade   :  { %v2161_v4 = vsel %vm2160_vm13, %v2159_v0, %v1931_v26 }
0x1adf   :  { %v2188_v2 = vadd.f32 %v2186_v58, %v2161_v4 }
0x1ae1   :  { %v2175_v7 = vpop.permute.xlu1 %2174  ;;  %2190 = vst.msk [vmem:[#allocation11] sm:$0x3] %vm2189_vm14, %v2188_v2 }
0x1ae2   :  { %2177 = vst.msk [vmem:[#allocation3 + $0x2] sm:$0x3] %vm75_vm2, %v2175_v7 }
0x1ae3   :  { %2973 = shalt.err (!%p2970_p6)
}
0x1ae4   :  { %s2974_s23 = scalar_lea.hbm %s3576_s11, 32 }
0x1ae5   :  { %p2975_p7 = scmp.ne.s32.totalorder %s3576_s11, %s2974_s23  ;;  %p2978_p8 = scmp.lt.u32.totalorder %s2974_s23, %s3576_s11 }
0x1ae7   :  { %p2980_p9 = pnand %p2978_p8, %p2975_p7 }
0x1ae9   :  { %2983 = shalt.err (!%p2980_p9)
}
0x1aea   :  { %2200 = dma.vmem_to_hbm [thread:$0]  %s2198_s18, 32, %s3576_s11, [#allocation8]  }
0x1aeb   :  { %2988 = dma.done.wait [#allocation8], 32  }
0x1aec   :  { %2989 = vsyncadd [#allocation8], 4294967264 }
0x1aed   :  { %2204 = vsyncpa [#allocation7], 1 }
0x1aee   :  { %2205 = vsyncpa [#allocation10], 1 }
0x1aef   :  { %2206 = vsyncpa [#allocation8], 1 }

</bundles_post_ra>
